<compile_context>
chip_gen: v6e
topology: v6e:2x2x1
jax: 0.10.0
libtpu: 0.0.40
codegen_flags: <defaults>
</compile_context>

<pallas_src>
import jax
import jax.numpy as jnp
from jax.experimental import pallas as pl
from jax.experimental.pallas import tpu as pltpu

EPS = 1e-5


# ----------------------------------------------------------------------------
# generation-aware budgets / tiling
# ----------------------------------------------------------------------------
def _budgets():
    """(vmem_limit_bytes, per-tile budget bytes) picked by TPU generation."""
    try:
        kind = jax.devices()[0].device_kind.lower()
    except Exception:
        kind = ""
    if ("v5" in kind) or ("v6" in kind):
        # 128 MiB physical VMEM: large tiles get the HBM-bound passes near
        # roofline and amortize per-grid-step overhead.
        return 96 * 1024 * 1024, 6 * 1024 * 1024
    # v7x (64 MiB physical) and unknown/interpret backends: stay conservative.
    return 48 * 1024 * 1024, 2 * 1024 * 1024


def _pick_tile_h(H, W, c_max, N, tile_budget_bytes):
    """Largest even divisor of H that fits the tile budget while keeping
    enough (N, nh) grid steps to feed two TensorCores (v7x)."""
    divs = [d for d in range(2, H + 1, 2) if H % d == 0]
    budget_rows = max(2, tile_budget_bytes // max(4 * c_max * W, 1))
    fits = [d for d in divs if d <= budget_rows] or [divs[0]]
    good = [d for d in fits if N * (H // d) >= 4]
    return max(good) if good else max(fits)


def _weight_groups(w_oihw, n_groups):
    """(Cout, Cin, 3, 3) -> (n_groups, (9//n_groups)*Cin, Cout) bf16.
    Tap order is (dy, dx) lexicographic, matching the kernel's patch concat."""
    cout, cin = w_oihw.shape[0], w_oihw.shape[1]
    w = jnp.transpose(w_oihw, (2, 3, 1, 0)).reshape(9 * cin, cout)
    return w.reshape(n_groups, (9 // n_groups) * cin, cout).astype(jnp.bfloat16)


# ----------------------------------------------------------------------------
# Pass A: 3x3 conv (bias-free) + per-tile BN partial sums
#         (optionally fusing the *previous* conv's BN+ReLU into the input)
# ----------------------------------------------------------------------------
def _make_conv_kernel(TH, W, Cin, Cout, n_groups, fuse_bn_relu, nh):
    tpg = 9 // n_groups

    def kernel(xm_ref, xh_ref, mean_ref, rstd_ref, w_ref, y_ref, st_ref):
        # Haloed row slab: TH main rows + 2 bottom-halo rows (value concat,
        # no scratch ref round trip).
        slab = jnp.concatenate([xm_ref[0], xh_ref[0]], axis=0)  # (TH+2, W+2, Cin)

        if fuse_bn_relu:
            # Previous conv's BatchNorm + ReLU fused into this conv's input
            # stage.  Rows/cols that are this conv's zero padding must end up
            # exactly 0 (zero-pad would otherwise map to relu(-mean*rstd)),
            # so mask them after the normalize.
            z = jnp.maximum(
                (slab.astype(jnp.float32) - mean_ref[...]) * rstd_ref[...], 0.0)
            row = (jax.lax.broadcasted_iota(jnp.int32, (TH + 2, W + 2, 1), 0)
                   + pl.program_id(1) * TH)
            col = jax.lax.broadcasted_iota(jnp.int32, (TH + 2, W + 2, 1), 1)
            valid = (row >= 1) & (row <= nh * TH) & (col >= 1) & (col <= W)
            slab = jnp.where(valid, z, 0.0).astype(jnp.bfloat16)

        # 3x3 conv as n_groups MXU matmuls with contraction depth tpg*Cin.
        acc = None
        for g in range(n_groups):
            taps = [divmod(t, 3) for t in range(g * tpg, (g + 1) * tpg)]
            patch = jnp.concatenate(
                [slab[dy:dy + TH, dx:dx + W, :] for dy, dx in taps],
                axis=-1).reshape(TH * W, tpg * Cin)
            d = jnp.dot(patch, w_ref[g], preferred_element_type=jnp.float32)
            acc = d if acc is None else acc + d

        y_ref[0] = acc.reshape(TH, W, Cout).astype(y_ref.dtype)

        # Per-tile BatchNorm partial sums from the f32 accumulator.
        s = jnp.sum(acc, axis=0, keepdims=True)
        q = jnp.sum(acc * acc, axis=0, keepdims=True)
        st_ref[0, 0] = jnp.concatenate([s, q], axis=0)

    return kernel


def _conv3x3_bn_stats(x_nhwc, w_oihw, mean_in, rstd_in, TH, vmem_limit):
    """3x3 SAME conv of x (optionally BN+ReLU-ing x in-kernel with the given
    stats first).  Returns y (bf16) and this conv's batch mean / rstd."""
    N, H, W, Cin = x_nhwc.shape
    Cout = w_oihw.shape[0]
    nh = H // TH
    fuse = mean_in is not None
    if not fuse:
        mean_in = jnp.zeros((1, Cin), jnp.float32)
        rstd_in = jnp.ones((1, Cin), jnp.float32)

    # Full-depth im2col (K = 9*Cin) for skinny first-conv inputs; per-row
    # grouping (K = 3*Cin) otherwise to bound the in-VMEM patch size.
    n_groups = 1 if Cin <= 16 else 3
    w_grp = _weight_groups(w_oihw, n_groups)

    # 1 halo row top/bottom, 1 halo col left/right; bf16 for bandwidth.
    xp = jnp.pad(x_nhwc, ((0, 0), (1, 1), (1, 1), (0, 0)))

    kernel = _make_conv_kernel(TH, W, Cin, Cout, n_groups, fuse, nh)
    flops = 2 * N * H * W * 9 * Cin * Cout
    bytes_accessed = (xp.size * 2 + w_grp.size * 2 + mean_in.size * 8
                      + N * H * W * Cout * 2 + N * nh * 2 * Cout * 4)

    y, stats = pl.pallas_call(
        kernel,
        out_shape=(jax.ShapeDtypeStruct((N, H, W, Cout), jnp.bfloat16),
                   jax.ShapeDtypeStruct((N, nh, 2, Cout), jnp.float32)),
        grid=(N, nh),
        in_specs=[
            # main TH rows of the padded input
            pl.BlockSpec((1, TH, W + 2, Cin), lambda b, i: (b, i, 0, 0)),
            # 2-row bottom halo (block height 2 -> any even row offset)
            pl.BlockSpec((1, 2, W + 2, Cin),
                         lambda b, i: (b, (i + 1) * (TH // 2), 0, 0)),
            pl.BlockSpec((1, Cin), lambda b, i: (0, 0)),
            pl.BlockSpec((1, Cin), lambda b, i: (0, 0)),
            # all weight groups stay VMEM-resident across the grid
            # TODO(synk): for very large Cout on v7x, add a Cout grid axis so
            # the resident weight block stays within 64 MiB VMEM.
            pl.BlockSpec((n_groups, (9 // n_groups) * Cin, Cout),
                         lambda b, i: (0, 0, 0)),
        ],
        out_specs=(
            pl.BlockSpec((1, TH, W, Cout), lambda b, i: (b, i, 0, 0)),
            pl.BlockSpec((1, 1, 2, Cout), lambda b, i: (b, i, 0, 0)),
        ),
        compiler_params=pltpu.CompilerParams(
            dimension_semantics=("parallel", "parallel"),
            vmem_limit_bytes=vmem_limit),
        cost_estimate=pl.CostEstimate(flops=flops, transcendentals=0,
                                      bytes_accessed=bytes_accessed),
    )(xp, xp, mean_in, rstd_in, w_grp)

    # Batch statistics (biased variance, training-mode BN), combined in f32.
    # TODO(synk): E[x^2]-E[x]^2 can cancel for very large N*H*W; a per-tile
    # mean-shifted combine would be safer at production scale.
    r = float(N * H * W)
    ssum = jnp.sum(stats[:, :, 0, :], axis=(0, 1))
    sqsum = jnp.sum(stats[:, :, 1, :], axis=(0, 1))
    mean = ssum / r
    var = jnp.maximum(sqsum / r - mean * mean, 0.0)
    rstd = jax.lax.rsqrt(var + EPS)
    return y, mean.reshape(1, Cout), rstd.reshape(1, Cout)


# ----------------------------------------------------------------------------
# Pass B: BN + ReLU (-> x) with a fused 2x2 max-pool (-> p)
# ----------------------------------------------------------------------------
def _make_bn_relu_pool_kernel(TH, W2, C):
    TH2 = TH // 2

    def kernel(y_ref, mean_ref, rstd_ref, x_ref, p_ref):
        # y is presented lane-dense as (TH, W/2, 2*C): even column's channels
        # in lanes [0:C], odd column's channels in lanes [C:2C].
        z = jnp.maximum(
            (y_ref[0].astype(jnp.float32) - mean_ref[...]) * rstd_ref[...], 0.0)
        x_ref[0] = z
        # 2x2 max-pool on the in-register tile: column pairs are a lane slice,
        # row pairs a leading-dim reshape -- no strided ref reads.
        cmax = jnp.maximum(z[:, :, :C], z[:, :, C:])      # (TH, W2, C)
        rp = cmax.reshape(TH2, 2, W2, C)
        p_ref[0] = jnp.maximum(rp[:, 0], rp[:, 1])        # (TH2, W2, C)

    return kernel


def _bn_relu_pool(y, mean, rstd, TH, vmem_limit):
    N, H, W, C = y.shape
    nh = H // TH
    W2, TH2 = W // 2, TH // 2
    # Row-major-compatible reshape (free): lane-dense stores (2*C lanes) and
    # the pool's column pairs become a lane slice inside the kernel.
    yr = y.reshape(N, H, W2, 2 * C)
    mean2 = jnp.concatenate([mean, mean], axis=-1)
    rstd2 = jnp.concatenate([rstd, rstd], axis=-1)

    kernel = _make_bn_relu_pool_kernel(TH, W2, C)
    xr, p = pl.pallas_call(
        kernel,
        out_shape=(jax.ShapeDtypeStruct((N, H, W2, 2 * C), jnp.float32),
                   jax.ShapeDtypeStruct((N, H // 2, W2, C), jnp.float32)),
        grid=(N, nh),
        in_specs=[
            pl.BlockSpec((1, TH, W2, 2 * C), lambda b, i: (b, i, 0, 0)),
            pl.BlockSpec((1, 2 * C), lambda b, i: (0, 0)),
            pl.BlockSpec((1, 2 * C), lambda b, i: (0, 0)),
        ],
        out_specs=(
            pl.BlockSpec((1, TH, W2, 2 * C), lambda b, i: (b, i, 0, 0)),
            pl.BlockSpec((1, TH2, W2, C), lambda b, i: (b, i, 0, 0)),
        ),
        compiler_params=pltpu.CompilerParams(
            dimension_semantics=("parallel", "parallel"),
            vmem_limit_bytes=vmem_limit),
    )(yr, mean2, rstd2)
    return xr.reshape(N, H, W, C), p


# ----------------------------------------------------------------------------
# Public forward (NCHW in / NCHW out, like the PyTorch module)
# ----------------------------------------------------------------------------
def encoder_block_forward(x_nchw, params):
    """encoder_block.forward: x (N,Cin,H,W) -> (x, p), both NCHW."""
    # NOTE: b1/b2 are kept in params for API parity with nn.Conv2d but are not
    # applied: affine=False, training-mode BatchNorm subtracts the per-channel
    # batch mean, which cancels an additive conv bias exactly.
    # TODO(synk): eval-mode BN with running stats would need the bias applied.
    x = jnp.transpose(x_nchw, (0, 2, 3, 1)).astype(jnp.bfloat16)   # NHWC bf16
    N, H, W, Cin = x.shape
    C1, C2 = params["w1"].shape[0], params["w2"].shape[0]
    if H % 2 or W % 2:
        # TODO(synk): odd H/W needs edge masking in BN stats + pool; UNet
        # feature maps are even so only that case is supported here.
        raise ValueError("encoder_block_forward requires even H and W")

    vmem_limit, tile_budget = _budgets()
    TH = _pick_tile_h(H, W, max(Cin, C1, C2), N, tile_budget)

    # conv1 (raw input) -> y1 (bf16) + batch stats.
    y1, mean1, rstd1 = _conv3x3_bn_stats(x, params["w1"], None, None,
                                         TH, vmem_limit)
    # conv2 consumes y1 with conv1's BN+ReLU fused into its input stage.
    y2, mean2, rstd2 = _conv3x3_bn_stats(y1, params["w2"], mean1, rstd1,
                                         TH, vmem_limit)
    # final BN -> ReLU -> x, with the 2x2 max-pool fused on the resident tile.
    xo, p = _bn_relu_pool(y2, mean2, rstd2, TH, vmem_limit)

    return jnp.transpose(xo, (0, 3, 1, 2)), jnp.transpose(p, (0, 3, 1, 2))


# ----------------------------------------------------------------------------
# Pure-JAX f32 reference (for the correctness check)
# ----------------------------------------------------------------------------
def _ref_forward(x_nchw, params):
    w1, b1, w2, b2 = params["w1"], params["b1"], params["w2"], params["b2"]

    def conv(x, w, b):
        y = jax.lax.conv_general_dilated(
            x, w, window_strides=(1, 1), padding="SAME",
            dimension_numbers=("NCHW", "OIHW", "NCHW"))
        return y + b[None, :, None, None]

    def bn_relu(y):
        mean = jnp.mean(y, axis=(0, 2, 3), keepdims=True)
        var = jnp.mean((y - mean) ** 2, axis=(0, 2, 3), keepdims=True)
        return jnp.maximum((y - mean) / jnp.sqrt(var + EPS), 0.0)

    z1 = bn_relu(conv(x_nchw, w1, b1))
    z2 = bn_relu(conv(z1, w2, b2))
    p = jax.lax.reduce_window(z2, -jnp.inf, jax.lax.max,
                              (1, 1, 2, 2), (1, 1, 2, 2), "VALID")
    return z2, p


# ----------------------------------------------------------------------------
def make_params(key, in_c, out_c):
    k1, k2, k3, k4 = jax.random.split(key, 4)
    s1 = 1.0 / (in_c * 9) ** 0.5
    s2 = 1.0 / (out_c * 9) ** 0.5
    return {
        "w1": jax.random.uniform(k1, (out_c, in_c, 3, 3), jnp.float32, -s1, s1),
        "b1": jax.random.uniform(k2, (out_c,), jnp.float32, -s1, s1),
        "w2": jax.random.uniform(k3, (out_c, out_c, 3, 3), jnp.float32, -s2, s2),
        "b2": jax.random.uniform(k4, (out_c,), jnp.float32, -s2, s2),
    }


if __name__ == "__main__":
    N, in_c, out_c, H, W = 2, 4, 8, 16, 16
    key = jax.random.PRNGKey(0)
    kx, kp = jax.random.split(key)
    x_nchw = jax.random.normal(kx, (N, in_c, H, W), jnp.float32)
    params = make_params(kp, in_c, out_c)

    fwd = jax.jit(encoder_block_forward)
    x_out, p_out = fwd(x_nchw, params)
    jax.block_until_ready((x_out, p_out))

    assert x_out.shape == (N, out_c, H, W)
    assert p_out.shape == (N, out_c, H // 2, W // 2)

    # numerical sanity check vs plain-JAX f32 reference (bf16 MXU operands and
    # bf16 conv intermediates; BN statistics kept in f32).
    x_ref, p_ref = _ref_forward(x_nchw, params)
    assert jnp.allclose(x_out, x_ref, atol=5e-2, rtol=5e-2), \
        float(jnp.max(jnp.abs(x_out - x_ref)))
    assert jnp.allclose(p_out, p_ref, atol=5e-2, rtol=5e-2), \
        float(jnp.max(jnp.abs(p_out - p_ref)))

    print("KERNEL_OK")
</pallas_src>

<mosaic_0001>
module attributes {stable_mosaic.version = 11 : i64} {
  func.func @kernel(%arg0: i32, %arg1: i32, %arg2: memref<1x8x18x4xbf16, #tpu.memory_space<vmem>>, %arg3: memref<1x2x18x4xbf16, #tpu.memory_space<vmem>>, %arg4: memref<1x4xf32, #tpu.memory_space<vmem>>, %arg5: memref<1x4xf32, #tpu.memory_space<vmem>>, %arg6: memref<1x36x8xbf16, #tpu.memory_space<vmem>>, %arg7: memref<1x8x16x8xbf16, #tpu.memory_space<vmem>>, %arg8: memref<1x1x2x8xf32, #tpu.memory_space<vmem>>) attributes {dimension_semantics = [#tpu.dimension_semantics<parallel>, #tpu.dimension_semantics<parallel>], iteration_bounds = array<i64: 2, 2>, scalar_prefetch = 0 : i64, scratch_operands = 0 : i64, tpu.core_type = #tpu.core_type<tc>, window_params = [{transform_indices = @transform_0, window_bounds = array<i64: 1, 8, 18, 4>}, {transform_indices = @transform_1, window_bounds = array<i64: 1, 2, 18, 4>}, {pipeline_mode = #tpu.pipeline_mode<synchronous>, transform_indices = @transform_2, window_bounds = array<i64: 1, 4>}, {pipeline_mode = #tpu.pipeline_mode<synchronous>, transform_indices = @transform_3, window_bounds = array<i64: 1, 4>}, {pipeline_mode = #tpu.pipeline_mode<synchronous>, transform_indices = @transform_4, window_bounds = array<i64: 1, 36, 8>}, {transform_indices = @transform_5, window_bounds = array<i64: 1, 8, 16, 8>}, {transform_indices = @transform_6, window_bounds = array<i64: 1, 1, 2, 8>}]} {
    %c0 = arith.constant 0 : index
    %c0_0 = arith.constant 0 : index
    %c0_1 = arith.constant 0 : index
    %c0_2 = arith.constant 0 : index
    %0 = vector.load %arg2[%c0, %c0_0, %c0_1, %c0_2] : memref<1x8x18x4xbf16, #tpu.memory_space<vmem>>, vector<1x8x18x4xbf16>
    %1 = vector.shape_cast %0 : vector<1x8x18x4xbf16> to vector<8x18x4xbf16>
    %c0_3 = arith.constant 0 : index
    %c0_4 = arith.constant 0 : index
    %c0_5 = arith.constant 0 : index
    %c0_6 = arith.constant 0 : index
    %2 = vector.load %arg3[%c0_3, %c0_4, %c0_5, %c0_6] : memref<1x2x18x4xbf16, #tpu.memory_space<vmem>>, vector<1x2x18x4xbf16>
    %3 = vector.shape_cast %2 : vector<1x2x18x4xbf16> to vector<2x18x4xbf16>
    %4 = tpu.concatenate %1, %3 in 0 : vector<8x18x4xbf16>, vector<2x18x4xbf16> -> vector<10x18x4xbf16>
    %5 = vector.extract_strided_slice %4 {offsets = [0, 0, 0], sizes = [8, 16, 4], strides = [1, 1, 1]} : vector<10x18x4xbf16> to vector<8x16x4xbf16>
    %6 = vector.extract_strided_slice %4 {offsets = [0, 1, 0], sizes = [8, 16, 4], strides = [1, 1, 1]} : vector<10x18x4xbf16> to vector<8x16x4xbf16>
    %7 = vector.extract_strided_slice %4 {offsets = [0, 2, 0], sizes = [8, 16, 4], strides = [1, 1, 1]} : vector<10x18x4xbf16> to vector<8x16x4xbf16>
    %8 = vector.extract_strided_slice %4 {offsets = [1, 0, 0], sizes = [8, 16, 4], strides = [1, 1, 1]} : vector<10x18x4xbf16> to vector<8x16x4xbf16>
    %9 = vector.extract_strided_slice %4 {offsets = [1, 1, 0], sizes = [8, 16, 4], strides = [1, 1, 1]} : vector<10x18x4xbf16> to vector<8x16x4xbf16>
    %10 = vector.extract_strided_slice %4 {offsets = [1, 2, 0], sizes = [8, 16, 4], strides = [1, 1, 1]} : vector<10x18x4xbf16> to vector<8x16x4xbf16>
    %11 = vector.extract_strided_slice %4 {offsets = [2, 0, 0], sizes = [8, 16, 4], strides = [1, 1, 1]} : vector<10x18x4xbf16> to vector<8x16x4xbf16>
    %12 = vector.extract_strided_slice %4 {offsets = [2, 1, 0], sizes = [8, 16, 4], strides = [1, 1, 1]} : vector<10x18x4xbf16> to vector<8x16x4xbf16>
    %13 = vector.extract_strided_slice %4 {offsets = [2, 2, 0], sizes = [8, 16, 4], strides = [1, 1, 1]} : vector<10x18x4xbf16> to vector<8x16x4xbf16>
    %14 = tpu.concatenate %5, %6, %7, %8, %9, %10, %11, %12, %13 in 2 : vector<8x16x4xbf16>, vector<8x16x4xbf16>, vector<8x16x4xbf16>, vector<8x16x4xbf16>, vector<8x16x4xbf16>, vector<8x16x4xbf16>, vector<8x16x4xbf16>, vector<8x16x4xbf16>, vector<8x16x4xbf16> -> vector<8x16x36xbf16>
    %15 = vector.shape_cast %14 : vector<8x16x36xbf16> to vector<128x36xbf16>
    %c0_7 = arith.constant 0 : index
    %c0_8 = arith.constant 0 : index
    %c0_9 = arith.constant 0 : index
    %16 = vector.load %arg6[%c0_7, %c0_8, %c0_9] : memref<1x36x8xbf16, #tpu.memory_space<vmem>>, vector<1x36x8xbf16>
    %17 = vector.shape_cast %16 : vector<1x36x8xbf16> to vector<36x8xbf16>
    %cst = arith.constant dense<0.000000e+00> : vector<128x8xf32>
    %18 = tpu.matmul %15, %17, %cst {dimension_numbers = #tpu.dot_dimension_numbers<[1], [0], [0], [1], [0, 0, 1, 1], [], []>} : vector<128x36xbf16>, vector<36x8xbf16>, vector<128x8xf32> -> vector<128x8xf32>
    %19 = vector.shape_cast %18 : vector<128x8xf32> to vector<8x16x8xf32>
    %20 = arith.truncf %19 : vector<8x16x8xf32> to vector<8x16x8xbf16>
    %c0_10 = arith.constant 0 : index
    %c0_11 = arith.constant 0 : index
    %c0_12 = arith.constant 0 : index
    %c0_13 = arith.constant 0 : index
    %21 = vector.load %arg7[%c0_10, %c0_11, %c0_12, %c0_13] : memref<1x8x16x8xbf16, #tpu.memory_space<vmem>>, vector<1x8x16x8xbf16>
    %22 = vector.shape_cast %21 : vector<1x8x16x8xbf16> to vector<8x16x8xbf16>
    %23 = vector.shape_cast %20 : vector<8x16x8xbf16> to vector<1x8x16x8xbf16>
    tpu.vector_store %arg7[%c0_10, %c0_11, %c0_12, %c0_13], %23 {strides = array<i32>} : memref<1x8x16x8xbf16, #tpu.memory_space<vmem>>, vector<1x8x16x8xbf16>,
    %cst_14 = arith.constant dense<0.000000e+00> : vector<8xf32>
    %24 = vector.multi_reduction <add>, %18, %cst_14 [0] : vector<128x8xf32> to vector<8xf32>
    %25 = vector.shape_cast %24 : vector<8xf32> to vector<1x8xf32>
    %26 = arith.mulf %18, %18 : vector<128x8xf32>
    %cst_15 = arith.constant dense<0.000000e+00> : vector<8xf32>
    %27 = vector.multi_reduction <add>, %26, %cst_15 [0] : vector<128x8xf32> to vector<8xf32>
    %28 = vector.shape_cast %27 : vector<8xf32> to vector<1x8xf32>
    %29 = tpu.concatenate %25, %28 in 0 : vector<1x8xf32>, vector<1x8xf32> -> vector<2x8xf32>
    %c0_16 = arith.constant 0 : index
    %c0_17 = arith.constant 0 : index
    %c0_18 = arith.constant 0 : index
    %c0_19 = arith.constant 0 : index
    %30 = vector.load %arg8[%c0_16, %c0_17, %c0_18, %c0_19] : memref<1x1x2x8xf32, #tpu.memory_space<vmem>>, vector<1x1x2x8xf32>
    %31 = vector.shape_cast %30 : vector<1x1x2x8xf32> to vector<2x8xf32>
    %32 = vector.shape_cast %29 : vector<2x8xf32> to vector<1x1x2x8xf32>
    tpu.vector_store %arg8[%c0_16, %c0_17, %c0_18, %c0_19], %32 {strides = array<i32>} : memref<1x1x2x8xf32, #tpu.memory_space<vmem>>, vector<1x1x2x8xf32>,
    return
  }
  func.func @transform_0(%arg0: i32, %arg1: i32) -> (i32, i32, i32, i32) {
    %c0_i32 = arith.constant 0 : i32
    %c0_i32_0 = arith.constant 0 : i32
    %c0_i32_1 = arith.constant 0 : i32
    return %arg0, %arg1, %c0_i32, %c0_i32_0 : i32, i32, i32, i32
  }
  func.func @transform_1(%arg0: i32, %arg1: i32) -> (i32, i32, i32, i32) {
    %c1_i32 = arith.constant 1 : i32
    %0 = arith.addi %arg1, %c1_i32 : i32
    %c4_i32 = arith.constant 4 : i32
    %1 = arith.muli %0, %c4_i32 : i32
    %c0_i32 = arith.constant 0 : i32
    %c0_i32_0 = arith.constant 0 : i32
    %c0_i32_1 = arith.constant 0 : i32
    return %arg0, %1, %c0_i32, %c0_i32_0 : i32, i32, i32, i32
  }
  func.func @transform_2(%arg0: i32, %arg1: i32) -> (i32, i32) {
    %c0_i32 = arith.constant 0 : i32
    %c0_i32_0 = arith.constant 0 : i32
    %c0_i32_1 = arith.constant 0 : i32
    return %c0_i32, %c0_i32_0 : i32, i32
  }
  func.func @transform_3(%arg0: i32, %arg1: i32) -> (i32, i32) {
    %c0_i32 = arith.constant 0 : i32
    %c0_i32_0 = arith.constant 0 : i32
    %c0_i32_1 = arith.constant 0 : i32
    return %c0_i32, %c0_i32_0 : i32, i32
  }
  func.func @transform_4(%arg0: i32, %arg1: i32) -> (i32, i32, i32) {
    %c0_i32 = arith.constant 0 : i32
    %c0_i32_0 = arith.constant 0 : i32
    %c0_i32_1 = arith.constant 0 : i32
    %c0_i32_2 = arith.constant 0 : i32
    return %c0_i32, %c0_i32_0, %c0_i32_1 : i32, i32, i32
  }
  func.func @transform_5(%arg0: i32, %arg1: i32) -> (i32, i32, i32, i32) {
    %c0_i32 = arith.constant 0 : i32
    %c0_i32_0 = arith.constant 0 : i32
    %c0_i32_1 = arith.constant 0 : i32
    return %arg0, %arg1, %c0_i32, %c0_i32_0 : i32, i32, i32, i32
  }
  func.func @transform_6(%arg0: i32, %arg1: i32) -> (i32, i32, i32, i32) {
    %c0_i32 = arith.constant 0 : i32
    %c0_i32_0 = arith.constant 0 : i32
    %c0_i32_1 = arith.constant 0 : i32
    return %arg0, %arg1, %c0_i32, %c0_i32_0 : i32, i32, i32, i32
  }
}

module attributes {stable_mosaic.version = 11 : i64} {
  func.func @kernel(%arg0: i32, %arg1: i32, %arg2: memref<1x8x18x8xbf16, #tpu.memory_space<vmem>>, %arg3: memref<1x2x18x8xbf16, #tpu.memory_space<vmem>>, %arg4: memref<1x8xf32, #tpu.memory_space<vmem>>, %arg5: memref<1x8xf32, #tpu.memory_space<vmem>>, %arg6: memref<1x72x8xbf16, #tpu.memory_space<vmem>>, %arg7: memref<1x8x16x8xbf16, #tpu.memory_space<vmem>>, %arg8: memref<1x1x2x8xf32, #tpu.memory_space<vmem>>) attributes {dimension_semantics = [#tpu.dimension_semantics<parallel>, #tpu.dimension_semantics<parallel>], iteration_bounds = array<i64: 2, 2>, scalar_prefetch = 0 : i64, scratch_operands = 0 : i64, tpu.core_type = #tpu.core_type<tc>, window_params = [{transform_indices = @transform_0, window_bounds = array<i64: 1, 8, 18, 8>}, {transform_indices = @transform_1, window_bounds = array<i64: 1, 2, 18, 8>}, {pipeline_mode = #tpu.pipeline_mode<synchronous>, transform_indices = @transform_2, window_bounds = array<i64: 1, 8>}, {pipeline_mode = #tpu.pipeline_mode<synchronous>, transform_indices = @transform_3, window_bounds = array<i64: 1, 8>}, {pipeline_mode = #tpu.pipeline_mode<synchronous>, transform_indices = @transform_4, window_bounds = array<i64: 1, 72, 8>}, {transform_indices = @transform_5, window_bounds = array<i64: 1, 8, 16, 8>}, {transform_indices = @transform_6, window_bounds = array<i64: 1, 1, 2, 8>}]} {
    %c0 = arith.constant 0 : index
    %c0_0 = arith.constant 0 : index
    %c0_1 = arith.constant 0 : index
    %c0_2 = arith.constant 0 : index
    %0 = vector.load %arg2[%c0, %c0_0, %c0_1, %c0_2] : memref<1x8x18x8xbf16, #tpu.memory_space<vmem>>, vector<1x8x18x8xbf16>
    %1 = vector.shape_cast %0 : vector<1x8x18x8xbf16> to vector<8x18x8xbf16>
    %c0_3 = arith.constant 0 : index
    %c0_4 = arith.constant 0 : index
    %c0_5 = arith.constant 0 : index
    %c0_6 = arith.constant 0 : index
    %2 = vector.load %arg3[%c0_3, %c0_4, %c0_5, %c0_6] : memref<1x2x18x8xbf16, #tpu.memory_space<vmem>>, vector<1x2x18x8xbf16>
    %3 = vector.shape_cast %2 : vector<1x2x18x8xbf16> to vector<2x18x8xbf16>
    %4 = tpu.concatenate %1, %3 in 0 : vector<8x18x8xbf16>, vector<2x18x8xbf16> -> vector<10x18x8xbf16>
    %5 = arith.extf %4 : vector<10x18x8xbf16> to vector<10x18x8xf32>
    %c0_7 = arith.constant 0 : index
    %c0_8 = arith.constant 0 : index
    %6 = vector.load %arg4[%c0_7, %c0_8] : memref<1x8xf32, #tpu.memory_space<vmem>>, vector<1x8xf32>
    %7 = vector.shape_cast %6 : vector<1x8xf32> to vector<1x1x8xf32>
    %8 = vector.broadcast %7 : vector<1x1x8xf32> to vector<10x18x8xf32>
    %9 = arith.subf %5, %8 : vector<10x18x8xf32>
    %c0_9 = arith.constant 0 : index
    %c0_10 = arith.constant 0 : index
    %10 = vector.load %arg5[%c0_9, %c0_10] : memref<1x8xf32, #tpu.memory_space<vmem>>, vector<1x8xf32>
    %11 = vector.shape_cast %10 : vector<1x8xf32> to vector<1x1x8xf32>
    %12 = vector.broadcast %11 : vector<1x1x8xf32> to vector<10x18x8xf32>
    %13 = arith.mulf %9, %12 : vector<10x18x8xf32>
    %cst = arith.constant 0.000000e+00 : f32
    %14 = vector.broadcast %cst : f32 to vector<10x18x8xf32>
    %15 = arith.maximumf %13, %14 : vector<10x18x8xf32>
    %16 = tpu.iota {dimensions = array<i32: 0>} : vector<10x18x1xi32>
    %c8_i32 = arith.constant 8 : i32
    %17 = arith.muli %arg1, %c8_i32 : i32
    %18 = vector.broadcast %17 : i32 to vector<10x18x1xi32>
    %19 = arith.addi %16, %18 : vector<10x18x1xi32>
    %20 = tpu.iota {dimensions = array<i32: 1>} : vector<10x18x1xi32>
    %c1_i32 = arith.constant 1 : i32
    %21 = vector.broadcast %c1_i32 : i32 to vector<10x18x1xi32>
    %22 = arith.cmpi sge, %19, %21 : vector<10x18x1xi32>
    %c16_i32 = arith.constant 16 : i32
    %23 = vector.broadcast %c16_i32 : i32 to vector<10x18x1xi32>
    %24 = arith.cmpi sle, %19, %23 : vector<10x18x1xi32>
    %25 = arith.andi %22, %24 : vector<10x18x1xi1>
    %c1_i32_11 = arith.constant 1 : i32
    %26 = vector.broadcast %c1_i32_11 : i32 to vector<10x18x1xi32>
    %27 = arith.cmpi sge, %20, %26 : vector<10x18x1xi32>
    %28 = arith.andi %25, %27 : vector<10x18x1xi1>
    %c16_i32_12 = arith.constant 16 : i32
    %29 = vector.broadcast %c16_i32_12 : i32 to vector<10x18x1xi32>
    %30 = arith.cmpi sle, %20, %29 : vector<10x18x1xi32>
    %31 = arith.andi %28, %30 : vector<10x18x1xi1>
    %cst_13 = arith.constant 0.000000e+00 : f32
    %32 = vector.shape_cast %31 : vector<10x18x1xi1> to vector<10x18x1xi1>
    %33 = vector.broadcast %32 : vector<10x18x1xi1> to vector<10x18x8xi1>
    %34 = vector.broadcast %cst_13 : f32 to vector<10x18x8xf32>
    %35 = arith.select %33, %15, %34 : vector<10x18x8xi1>, vector<10x18x8xf32>
    %36 = arith.truncf %35 : vector<10x18x8xf32> to vector<10x18x8xbf16>
    %37 = vector.extract_strided_slice %36 {offsets = [0, 0, 0], sizes = [8, 16, 8], strides = [1, 1, 1]} : vector<10x18x8xbf16> to vector<8x16x8xbf16>
    %38 = vector.extract_strided_slice %36 {offsets = [0, 1, 0], sizes = [8, 16, 8], strides = [1, 1, 1]} : vector<10x18x8xbf16> to vector<8x16x8xbf16>
    %39 = vector.extract_strided_slice %36 {offsets = [0, 2, 0], sizes = [8, 16, 8], strides = [1, 1, 1]} : vector<10x18x8xbf16> to vector<8x16x8xbf16>
    %40 = vector.extract_strided_slice %36 {offsets = [1, 0, 0], sizes = [8, 16, 8], strides = [1, 1, 1]} : vector<10x18x8xbf16> to vector<8x16x8xbf16>
    %41 = vector.extract_strided_slice %36 {offsets = [1, 1, 0], sizes = [8, 16, 8], strides = [1, 1, 1]} : vector<10x18x8xbf16> to vector<8x16x8xbf16>
    %42 = vector.extract_strided_slice %36 {offsets = [1, 2, 0], sizes = [8, 16, 8], strides = [1, 1, 1]} : vector<10x18x8xbf16> to vector<8x16x8xbf16>
    %43 = vector.extract_strided_slice %36 {offsets = [2, 0, 0], sizes = [8, 16, 8], strides = [1, 1, 1]} : vector<10x18x8xbf16> to vector<8x16x8xbf16>
    %44 = vector.extract_strided_slice %36 {offsets = [2, 1, 0], sizes = [8, 16, 8], strides = [1, 1, 1]} : vector<10x18x8xbf16> to vector<8x16x8xbf16>
    %45 = vector.extract_strided_slice %36 {offsets = [2, 2, 0], sizes = [8, 16, 8], strides = [1, 1, 1]} : vector<10x18x8xbf16> to vector<8x16x8xbf16>
    %46 = tpu.concatenate %37, %38, %39, %40, %41, %42, %43, %44, %45 in 2 : vector<8x16x8xbf16>, vector<8x16x8xbf16>, vector<8x16x8xbf16>, vector<8x16x8xbf16>, vector<8x16x8xbf16>, vector<8x16x8xbf16>, vector<8x16x8xbf16>, vector<8x16x8xbf16>, vector<8x16x8xbf16> -> vector<8x16x72xbf16>
    %47 = vector.shape_cast %46 : vector<8x16x72xbf16> to vector<128x72xbf16>
    %c0_14 = arith.constant 0 : index
    %c0_15 = arith.constant 0 : index
    %c0_16 = arith.constant 0 : index
    %48 = vector.load %arg6[%c0_14, %c0_15, %c0_16] : memref<1x72x8xbf16, #tpu.memory_space<vmem>>, vector<1x72x8xbf16>
    %49 = vector.shape_cast %48 : vector<1x72x8xbf16> to vector<72x8xbf16>
    %cst_17 = arith.constant dense<0.000000e+00> : vector<128x8xf32>
    %50 = tpu.matmul %47, %49, %cst_17 {dimension_numbers = #tpu.dot_dimension_numbers<[1], [0], [0], [1], [0, 0, 1, 1], [], []>} : vector<128x72xbf16>, vector<72x8xbf16>, vector<128x8xf32> -> vector<128x8xf32>
    %51 = vector.shape_cast %50 : vector<128x8xf32> to vector<8x16x8xf32>
    %52 = arith.truncf %51 : vector<8x16x8xf32> to vector<8x16x8xbf16>
    %c0_18 = arith.constant 0 : index
    %c0_19 = arith.constant 0 : index
    %c0_20 = arith.constant 0 : index
    %c0_21 = arith.constant 0 : index
    %53 = vector.load %arg7[%c0_18, %c0_19, %c0_20, %c0_21] : memref<1x8x16x8xbf16, #tpu.memory_space<vmem>>, vector<1x8x16x8xbf16>
    %54 = vector.shape_cast %53 : vector<1x8x16x8xbf16> to vector<8x16x8xbf16>
    %55 = vector.shape_cast %52 : vector<8x16x8xbf16> to vector<1x8x16x8xbf16>
    tpu.vector_store %arg7[%c0_18, %c0_19, %c0_20, %c0_21], %55 {strides = array<i32>} : memref<1x8x16x8xbf16, #tpu.memory_space<vmem>>, vector<1x8x16x8xbf16>,
    %cst_22 = arith.constant dense<0.000000e+00> : vector<8xf32>
    %56 = vector.multi_reduction <add>, %50, %cst_22 [0] : vector<128x8xf32> to vector<8xf32>
    %57 = vector.shape_cast %56 : vector<8xf32> to vector<1x8xf32>
    %58 = arith.mulf %50, %50 : vector<128x8xf32>
    %cst_23 = arith.constant dense<0.000000e+00> : vector<8xf32>
    %59 = vector.multi_reduction <add>, %58, %cst_23 [0] : vector<128x8xf32> to vector<8xf32>
    %60 = vector.shape_cast %59 : vector<8xf32> to vector<1x8xf32>
    %61 = tpu.concatenate %57, %60 in 0 : vector<1x8xf32>, vector<1x8xf32> -> vector<2x8xf32>
    %c0_24 = arith.constant 0 : index
    %c0_25 = arith.constant 0 : index
    %c0_26 = arith.constant 0 : index
    %c0_27 = arith.constant 0 : index
    %62 = vector.load %arg8[%c0_24, %c0_25, %c0_26, %c0_27] : memref<1x1x2x8xf32, #tpu.memory_space<vmem>>, vector<1x1x2x8xf32>
    %63 = vector.shape_cast %62 : vector<1x1x2x8xf32> to vector<2x8xf32>
    %64 = vector.shape_cast %61 : vector<2x8xf32> to vector<1x1x2x8xf32>
    tpu.vector_store %arg8[%c0_24, %c0_25, %c0_26, %c0_27], %64 {strides = array<i32>} : memref<1x1x2x8xf32, #tpu.memory_space<vmem>>, vector<1x1x2x8xf32>,
    return
  }
  func.func @transform_0(%arg0: i32, %arg1: i32) -> (i32, i32, i32, i32) {
    %c0_i32 = arith.constant 0 : i32
    %c0_i32_0 = arith.constant 0 : i32
    %c0_i32_1 = arith.constant 0 : i32
    return %arg0, %arg1, %c0_i32, %c0_i32_0 : i32, i32, i32, i32
  }
  func.func @transform_1(%arg0: i32, %arg1: i32) -> (i32, i32, i32, i32) {
    %c1_i32 = arith.constant 1 : i32
    %0 = arith.addi %arg1, %c1_i32 : i32
    %c4_i32 = arith.constant 4 : i32
    %1 = arith.muli %0, %c4_i32 : i32
    %c0_i32 = arith.constant 0 : i32
    %c0_i32_0 = arith.constant 0 : i32
    %c0_i32_1 = arith.constant 0 : i32
    return %arg0, %1, %c0_i32, %c0_i32_0 : i32, i32, i32, i32
  }
  func.func @transform_2(%arg0: i32, %arg1: i32) -> (i32, i32) {
    %c0_i32 = arith.constant 0 : i32
    %c0_i32_0 = arith.constant 0 : i32
    %c0_i32_1 = arith.constant 0 : i32
    return %c0_i32, %c0_i32_0 : i32, i32
  }
  func.func @transform_3(%arg0: i32, %arg1: i32) -> (i32, i32) {
    %c0_i32 = arith.constant 0 : i32
    %c0_i32_0 = arith.constant 0 : i32
    %c0_i32_1 = arith.constant 0 : i32
    return %c0_i32, %c0_i32_0 : i32, i32
  }
  func.func @transform_4(%arg0: i32, %arg1: i32) -> (i32, i32, i32) {
    %c0_i32 = arith.constant 0 : i32
    %c0_i32_0 = arith.constant 0 : i32
    %c0_i32_1 = arith.constant 0 : i32
    %c0_i32_2 = arith.constant 0 : i32
    return %c0_i32, %c0_i32_0, %c0_i32_1 : i32, i32, i32
  }
  func.func @transform_5(%arg0: i32, %arg1: i32) -> (i32, i32, i32, i32) {
    %c0_i32 = arith.constant 0 : i32
    %c0_i32_0 = arith.constant 0 : i32
    %c0_i32_1 = arith.constant 0 : i32
    return %arg0, %arg1, %c0_i32, %c0_i32_0 : i32, i32, i32, i32
  }
  func.func @transform_6(%arg0: i32, %arg1: i32) -> (i32, i32, i32, i32) {
    %c0_i32 = arith.constant 0 : i32
    %c0_i32_0 = arith.constant 0 : i32
    %c0_i32_1 = arith.constant 0 : i32
    return %arg0, %arg1, %c0_i32, %c0_i32_0 : i32, i32, i32, i32
  }
}

module attributes {stable_mosaic.version = 11 : i64} {
  func.func @kernel(%arg0: i32, %arg1: i32, %arg2: memref<1x8x8x16xbf16, #tpu.memory_space<vmem>>, %arg3: memref<1x16xf32, #tpu.memory_space<vmem>>, %arg4: memref<1x16xf32, #tpu.memory_space<vmem>>, %arg5: memref<1x8x8x16xf32, #tpu.memory_space<vmem>>, %arg6: memref<1x4x8x8xf32, #tpu.memory_space<vmem>>) attributes {dimension_semantics = [#tpu.dimension_semantics<parallel>, #tpu.dimension_semantics<parallel>], iteration_bounds = array<i64: 2, 2>, scalar_prefetch = 0 : i64, scratch_operands = 0 : i64, tpu.core_type = #tpu.core_type<tc>, window_params = [{transform_indices = @transform_0, window_bounds = array<i64: 1, 8, 8, 16>}, {pipeline_mode = #tpu.pipeline_mode<synchronous>, transform_indices = @transform_1, window_bounds = array<i64: 1, 16>}, {pipeline_mode = #tpu.pipeline_mode<synchronous>, transform_indices = @transform_2, window_bounds = array<i64: 1, 16>}, {transform_indices = @transform_3, window_bounds = array<i64: 1, 8, 8, 16>}, {transform_indices = @transform_4, window_bounds = array<i64: 1, 4, 8, 8>}]} {
    %c0 = arith.constant 0 : index
    %c0_0 = arith.constant 0 : index
    %c0_1 = arith.constant 0 : index
    %c0_2 = arith.constant 0 : index
    %0 = vector.load %arg2[%c0, %c0_0, %c0_1, %c0_2] : memref<1x8x8x16xbf16, #tpu.memory_space<vmem>>, vector<1x8x8x16xbf16>
    %1 = vector.shape_cast %0 : vector<1x8x8x16xbf16> to vector<8x8x16xbf16>
    %2 = arith.extf %1 : vector<8x8x16xbf16> to vector<8x8x16xf32>
    %c0_3 = arith.constant 0 : index
    %c0_4 = arith.constant 0 : index
    %3 = vector.load %arg3[%c0_3, %c0_4] : memref<1x16xf32, #tpu.memory_space<vmem>>, vector<1x16xf32>
    %4 = vector.shape_cast %3 : vector<1x16xf32> to vector<1x1x16xf32>
    %5 = vector.broadcast %4 : vector<1x1x16xf32> to vector<8x8x16xf32>
    %6 = arith.subf %2, %5 : vector<8x8x16xf32>
    %c0_5 = arith.constant 0 : index
    %c0_6 = arith.constant 0 : index
    %7 = vector.load %arg4[%c0_5, %c0_6] : memref<1x16xf32, #tpu.memory_space<vmem>>, vector<1x16xf32>
    %8 = vector.shape_cast %7 : vector<1x16xf32> to vector<1x1x16xf32>
    %9 = vector.broadcast %8 : vector<1x1x16xf32> to vector<8x8x16xf32>
    %10 = arith.mulf %6, %9 : vector<8x8x16xf32>
    %cst = arith.constant 0.000000e+00 : f32
    %11 = vector.broadcast %cst : f32 to vector<8x8x16xf32>
    %12 = arith.maximumf %10, %11 : vector<8x8x16xf32>
    %c0_7 = arith.constant 0 : index
    %c0_8 = arith.constant 0 : index
    %c0_9 = arith.constant 0 : index
    %c0_10 = arith.constant 0 : index
    %13 = vector.load %arg5[%c0_7, %c0_8, %c0_9, %c0_10] : memref<1x8x8x16xf32, #tpu.memory_space<vmem>>, vector<1x8x8x16xf32>
    %14 = vector.shape_cast %13 : vector<1x8x8x16xf32> to vector<8x8x16xf32>
    %15 = vector.shape_cast %12 : vector<8x8x16xf32> to vector<1x8x8x16xf32>
    tpu.vector_store %arg5[%c0_7, %c0_8, %c0_9, %c0_10], %15 {strides = array<i32>} : memref<1x8x8x16xf32, #tpu.memory_space<vmem>>, vector<1x8x8x16xf32>,
    %16 = vector.extract_strided_slice %12 {offsets = [0, 0, 0], sizes = [8, 8, 8], strides = [1, 1, 1]} : vector<8x8x16xf32> to vector<8x8x8xf32>
    %17 = vector.extract_strided_slice %12 {offsets = [0, 0, 8], sizes = [8, 8, 8], strides = [1, 1, 1]} : vector<8x8x16xf32> to vector<8x8x8xf32>
    %18 = arith.maximumf %16, %17 : vector<8x8x8xf32>
    %19 = vector.shape_cast %18 : vector<8x8x8xf32> to vector<4x2x8x8xf32>
    %20 = vector.extract_strided_slice %19 {offsets = [0, 0, 0, 0], sizes = [4, 1, 8, 8], strides = [1, 1, 1, 1]} : vector<4x2x8x8xf32> to vector<4x1x8x8xf32>
    %21 = vector.shape_cast %20 : vector<4x1x8x8xf32> to vector<4x8x8xf32>
    %22 = vector.extract_strided_slice %19 {offsets = [0, 1, 0, 0], sizes = [4, 1, 8, 8], strides = [1, 1, 1, 1]} : vector<4x2x8x8xf32> to vector<4x1x8x8xf32>
    %23 = vector.shape_cast %22 : vector<4x1x8x8xf32> to vector<4x8x8xf32>
    %24 = arith.maximumf %21, %23 : vector<4x8x8xf32>
    %c0_11 = arith.constant 0 : index
    %c0_12 = arith.constant 0 : index
    %c0_13 = arith.constant 0 : index
    %c0_14 = arith.constant 0 : index
    %25 = vector.load %arg6[%c0_11, %c0_12, %c0_13, %c0_14] : memref<1x4x8x8xf32, #tpu.memory_space<vmem>>, vector<1x4x8x8xf32>
    %26 = vector.shape_cast %25 : vector<1x4x8x8xf32> to vector<4x8x8xf32>
    %27 = vector.shape_cast %24 : vector<4x8x8xf32> to vector<1x4x8x8xf32>
    tpu.vector_store %arg6[%c0_11, %c0_12, %c0_13, %c0_14], %27 {strides = array<i32>} : memref<1x4x8x8xf32, #tpu.memory_space<vmem>>, vector<1x4x8x8xf32>,
    return
  }
  func.func @transform_0(%arg0: i32, %arg1: i32) -> (i32, i32, i32, i32) {
    %c0_i32 = arith.constant 0 : i32
    %c0_i32_0 = arith.constant 0 : i32
    %c0_i32_1 = arith.constant 0 : i32
    return %arg0, %arg1, %c0_i32, %c0_i32_0 : i32, i32, i32, i32
  }
  func.func @transform_1(%arg0: i32, %arg1: i32) -> (i32, i32) {
    %c0_i32 = arith.constant 0 : i32
    %c0_i32_0 = arith.constant 0 : i32
    %c0_i32_1 = arith.constant 0 : i32
    return %c0_i32, %c0_i32_0 : i32, i32
  }
  func.func @transform_2(%arg0: i32, %arg1: i32) -> (i32, i32) {
    %c0_i32 = arith.constant 0 : i32
    %c0_i32_0 = arith.constant 0 : i32
    %c0_i32_1 = arith.constant 0 : i32
    return %c0_i32, %c0_i32_0 : i32, i32
  }
  func.func @transform_3(%arg0: i32, %arg1: i32) -> (i32, i32, i32, i32) {
    %c0_i32 = arith.constant 0 : i32
    %c0_i32_0 = arith.constant 0 : i32
    %c0_i32_1 = arith.constant 0 : i32
    return %arg0, %arg1, %c0_i32, %c0_i32_0 : i32, i32, i32, i32
  }
  func.func @transform_4(%arg0: i32, %arg1: i32) -> (i32, i32, i32, i32) {
    %c0_i32 = arith.constant 0 : i32
    %c0_i32_0 = arith.constant 0 : i32
    %c0_i32_1 = arith.constant 0 : i32
    return %arg0, %arg1, %c0_i32, %c0_i32_0 : i32, i32, i32, i32
  }
}

</mosaic_0001>

<bundles_post_ra>
// kernel: encoder_block_forward.3
= control target key start
LH: loop header
LB: loop body
LE: loop exit
PB: predicated region body
PF: predicated region fallthrough
CT: control target
= control target key end

     0   :  { %s1692_s21 = smov 0   ;;  %s1694_s22 = smov 0   ;;  %s2144_s0 = inlined_call_operand.vmem [shape: bf16[2,18,18,4], index: 0, kind: input, shape index: {}, may-alias: {0,1}]   ;;  %s2145_s1 = inlined_call_operand.vmem [shape: bf16[2,18,18,4], index: 1, kind: input, shape index: {}, may-alias: {0,1}]   ;;  %s2146_s2 = inlined_call_operand.vmem [shape: f32[1,4], index: 2, kind: input, shape index: {}]   ;;  %s2147_s3 = inlined_call_operand.vmem [shape: f32[1,4], index: 3, kind: input, shape index: {}]   ;;  %s2148_s4 = inlined_call_operand.vmem [shape: bf16[1,36,8], index: 4, kind: input, shape index: {}]   ;;  %s2149_s5 = inlined_call_operand.vmem [shape: bf16[2,16,16,8], index: 5, kind: output, shape index: {0}]   ;;  %s2150_s6 = inlined_call_operand.vmem [shape: f32[2,2,2,8], index: 6, kind: output, shape index: {1}]  }
   0x1   :  { %s1696_s23 = smov 0   ;;  %s1698_s24 = smov 0  }
   0x2   :  { %s1700_s2 = smov 0  }
   0x3 LB: > { %s26_s3 = sadd.s32 1, %s1639_s23  ;;  %s29_s25 = sadd.s32 1, %s1643_s24  ;;  %s1647_s2 = sphi %s1700_s2, %s17_s2   ;;  %s1643_s24 = sphi %s1698_s24, %s2154_s24   ;;  %s1639_s23 = sphi %s1696_s23, %s2153_s23   ;;  %s1635_s22 = sphi %s1694_s22, %s2152_s22   ;;  %s1631_s21 = sphi %s1692_s21, %s2151_s21  }
   0x4   : > { %p27_p0 = scmp.ge.s32.totalorder %s26_s3, 2  ;;  %p1408_p1 = scmp.ge.s32.totalorder %s1647_s2, 1 }
   0x5   : > { %p275_p2 = scmp.lt.s32.totalorder %s1647_s2, 5 }
   0x6   : > { %s2156_s3 = smov (%p27_p0, %s26_s3), 0  ;;  %s2158_s25 = smov (!%p27_p0, %s29_s25), %s1643_s24 }
   0x7   : > { %p276_p3 = pnand %p1408_p1, %p275_p2  ;;  %p31_p4 = scmp.ge.s32.totalorder %s2158_s25, 2 }
   0x8   : > { %s1725_s26 = sshll.u32 (!%p276_p3), %s1631_s21, 3  ;;  %p346_p5 = scmp.lt.s32.totalorder (!%p276_p3), %s1635_s22, 1 }
   0x9   : > { %s2160_s25 = smov (%p31_p4, %s2158_s25), 0  ;;  %279 = sbr.rel (%p276_p3) target bundleno = 486 (0x1e6), region = 40 }
   0xa   : > { %p348_p6 = scmp.lt.s32.totalorder (!%p276_p3), %s1725_s26, 17  ;;  %s1649_s11 = smov (!%p276_p3), 12  }
   0xb   : > { %s1650_s12 = smov (!%p276_p3), 24   ;;  %s1493_s13 = sadd.s32 (!%p276_p3), 8, %s1725_s26 }
   0xc   : > { %s1651_s14 = smov (!%p276_p3), 8   ;;  %s1652_s15 = smov (!%p276_p3), 20  }
   0xd   : > { %p366_p7 = scmp.lt.s32.totalorder (!%p276_p3), %s1493_s13, 17  ;;  %s1653_s16 = smov (!%p276_p3), 4  }
   0xe   : > { %s2162_s22 = smov (!%p346_p5, %s1635_s22), 1  ;;  %vm603_vm0 = vcmask 1046528   ;;  %vm490_vm1 = vsmask.f32 7424  ;;  %s1654_s18 = smov 16   ;;  %vm959_vm2 = vcmask 1041408  }
   0xf   : > { %s349_s27 = scalar_select %p348_p6, %s1725_s26, 17  ;;  %vm786_vm3 = vcmask 31744   ;;  %vm803_vm4 = vcmask 64512   ;;  %vm820_vm5 = vcmask 97280   ;;  %vm837_vm6 = vcmask 130048  }
  0x10   : > { %s1536_s28 = smul.u32 54, %s2162_s22  ;;  %s2164_s13 = smov (!%p366_p7, %s1493_s13), 17  ;;  %vm854_vm7 = vcmask 162816   ;;  %vm871_vm8 = vcmask 195584   ;;  %vm888_vm9 = vcmask 228352   ;;  %vm905_vm10 = vcmask 261120  }
  0x11   : > { %s1535_s29 = smul.u32 3, %s349_s27  ;;  %s1656_s9 = smov 32   ;;  %vm942_vm11 = vcmask 293888   ;;  %vm1124_vm12 = vcmask 60416   ;;  %vm1231_vm13 = vcmask 1040384   ;;  %vm1233_vm14 = vcmask 58368  }
  0x12   : > { %s1537_s17 = smul.u32 3, %s2164_s13  ;;  %p379_p8 = scmp.lt.s32.totalorder %s1725_s26, 15 }
  0x13   : > { %s352_s30 = sadd.s32 %s1536_s28, %s1535_s29  ;;  %p389_p9 = scmp.lt.s32.totalorder %s1631_s21, 1 }
  0x14   : > { %s1410_s7 = sshll.u32 %s352_s30, 2  ;;  %s370_s19 = sadd.s32 %s1537_s17, %s1536_s28 }
  0x15   : > { %s1737_s10 = scalar_lea.vmem %s2144_s0, %s1410_s7  ;;  %s1413_s20 = sshll.u32 %s370_s19, 2 }
  0x16   : > { %v1740_v0 = vld [vmem:[%s1737_s10 + $0x18] sm:$0xff]   ;;  %v1743_v1 = vld [vmem:[%s1737_s10 + $0xc] sm:$0xff]   ;;  %v1748_v2 = vld [vmem:[%s1737_s10 + $0x24] sm:$0xff]   ;;  %s372_s30 = scalar_lea.vmem %s2145_s1, %s1413_s20  ;;  %s1655_s7 = smov 28  }
  0x17   : > { %651 = vrot.lane.b32.xlu1 %v1740_v0, %s1649_s11  ;;  %649 = vrot.lane.b32.xlu0 %v1743_v1, %s1649_s11  ;;  %v1589_v3 = vld [vmem:[%s1737_s10 + $0x14] ss:$0 sps:$4 sm:$0x11]   ;;  %v607_v4 = vrot.slane %v1743_v1, 1  ;;  %v1755_v6 = vld [vmem:[%s1737_s10] sm:$0xff]   ;;  %v610_v8 = vrot.slane %v1740_v0, 1 }
  0x18   : > { %v608_v5 = vrot.slane %v1589_v3, 1  ;;  %v1591_v7 = vld [vmem:[%s1737_s10 + $0x8] ss:$0 sps:$4 sm:$0x11]   ;;  %v506_v10 = vshll.u32 %v1743_v1, 16  ;;  %v604_v12 = vrot.slane %v1755_v6, 1 }
  0x19   : > { %v1592_v9 = vld [vmem:[%s1737_s10 + $0x20] ss:$0 sps:$4 sm:$0x11]   ;;  %v605_v13 = vrot.slane %v1591_v7, 1  ;;  %v504_v14 = vshrl.u32 %v1743_v1, 16  ;;  %v492_v15 = vshrl.u32 %v1755_v6, 16 }
  0x1a   : > { %v609_v11 = vsel %vm603_vm0, %v607_v4, %v608_v5  ;;  %v494_v16 = vshll.u32 %v1755_v6, 16  ;;  %v499_v17 = vshll.u32 %v1591_v7, 16  ;;  %v508_v18 = vrot.slane %v506_v10, 1  ;;  %v1774_v23 = vld [vmem:[%s1737_s10 + $0x2c] ss:$0 sps:$4 sm:$0x11]  }
  0x1b   : > { %722 = vrot.lane.b32.xlu1 %v1748_v2, %s1650_s12  ;;  %720 = vrot.lane.b32.xlu0 %v1740_v0, %s1650_s12  ;;  %v606_v19 = vsel %vm603_vm0, %v604_v12, %v605_v13  ;;  %v611_v20 = vrot.slane %v1592_v9, 1  ;;  %v511_v21 = vshll.u32 %v1589_v3, 16  ;;  %v518_v22 = vshll.u32 %v1740_v0, 16  ;;  %v1792_v41 = vld [vmem:[%s1737_s10 + $0x48] sm:$0xff]   ;;  %v1799_v42 = vld [vmem:[%s1737_s10 + $0x54] sm:$0xff]   ;;  %s2166_s26 = smov (!%p379_p8, %s1725_s26), 15 }
  0x1c   : > { %v496_v24 = vrot.slane %v494_v16, 1  ;;  %v501_v25 = vrot.slane %v499_v17, 1  ;;  %v516_v26 = vshrl.u32 %v1740_v0, 16  ;;  %v523_v28 = vshll.u32 %v1592_v9, 16  ;;  %v1811_v50 = vld [vmem:[%s1737_s10 + $0x30] sm:$0xff]   ;;  %v1836_v4 = vld [vmem:[%s372_s30] sm:$0xff]  }
  0x1d   : > { %v520_v27 = vrot.slane %v518_v22, 1  ;;  %v509_v30 = vor.u32 %v508_v18, %v504_v14  ;;  %v513_v31 = vrot.slane %v511_v21, 1  ;;  %v530_v32 = vshll.u32 %v1748_v2, 16  ;;  %v1804_v46 = vld [vmem:[%s1737_s10 + $0x50] ss:$0 sps:$4 sm:$0x11]  }
  0x1e   : > { %v497_v29 = vor.u32 %v496_v24, %v492_v15  ;;  %v1785_v34 = vsel %vm603_vm0, %v610_v8, %v611_v20  ;;  %v528_v35 = vshrl.u32 %v1748_v2, 16  ;;  %v525_v37 = vrot.slane %v523_v28, 1  ;;  %v1601_v49 = vld [vmem:[%s1737_s10 + $0x5c] ss:$0 sps:$4 sm:$0x11]   ;;  %v1842_v8 = vld [vmem:[%s372_s30 + $0xc] sm:$0xff]  }
  0x1f   : > { %628 = vrot.lane.b32.xlu1 %v606_v19, %s1651_s14  ;;  %699 = vrot.lane.b32.xlu0 %v609_v11, %s1652_s15  ;;  %v521_v36 = vor.u32 %v520_v27, %v516_v26  ;;  %v532_v38 = vrot.slane %v530_v32, 1  ;;  %v535_v39 = vshll.u32 %v1774_v23, 16  ;;  %v514_v40 = vsel %vm490_vm1, %v509_v30, %v513_v31  ;;  %v1606_v5 = vld [vmem:[%s2148_s4 + $0x10] ss:$0 sps:$4 sm:$0x33]   ;;  %v1607_v24 = vld [vmem:[%s2148_s4 + $0x8] sm:$0xff]  }
  0x20   : > { %v502_v33 = vsel %vm490_vm1, %v497_v29, %v501_v25  ;;  %v622_v47 = vrot.slane %v1792_v41, 1  ;;  %v623_v48 = vrot.slane %v1804_v46, 1  ;;  %v576_v51 = vshrl.u32 %v1799_v42, 16  ;;  %v1603_v7 = vld [vmem:[%s372_s30 + $0x8] ss:$0 sps:$4 sm:$0x11]   ;;  %1533 = vmatprep.subr.msk.bf16.mxu0 %vm959_vm2, %v1606_v5  ;;  %1534 = vmatprep.subr.msk.bf16.mxu1 %vm959_vm2, %v1606_v5 }
  0x21   : > { %v526_v43 = vsel %vm490_vm1, %v521_v36, %v525_v37  ;;  %v533_v44 = vor.u32 %v532_v38, %v528_v35  ;;  %v537_v45 = vrot.slane %v535_v39, 1  ;;  %v578_v52 = vshll.u32 %v1799_v42, 16  ;;  %v1595_v13 = vld [vmem:[%s1737_s10 + $0x38] ss:$0 sps:$4 sm:$0x11]   ;;  %v1608_v38 = vld [vmem:[%s2148_s4] sm:$0xff]  }
  0x22   : > { %v625_v53 = vrot.slane %v1799_v42, 1  ;;  %v1821_v55 = vsel %vm603_vm0, %v622_v47, %v623_v48  ;;  %v583_v56 = vshll.u32 %v1601_v49, 16  ;;  %v626_v58 = vrot.slane %v1601_v49, 1  ;;  %v1605_v18 = vld [vmem:[%s372_s30 + $0x14] ss:$0 sps:$4 sm:$0x11]  }
  0x23   : > { %630 = vrot.lane.b32.xlu1 %v609_v11, %s1651_s14  ;;  %587 = vrot.lane.b32.xlu0 %v502_v33, %s1653_s16  ;;  %v1818_v54 = vsel %vm490_vm1, %v533_v44, %v537_v45  ;;  %v580_v57 = vrot.slane %v578_v52, 1  ;;  %v613_v59 = vrot.slane %v1748_v2, 1  ;;  %v614_v60 = vrot.slane %v1774_v23, 1  ;;  %v1884_v44 = vld [vmem:[%s1737_s10 + $0x3c] sm:$0xff]   ;;  %s2168_s21 = smov (!%p389_p9, %s1631_s21), 1 }
  0x24   : > { %v585_v61 = vrot.slane %v583_v56, 1  ;;  %v542_v62 = vshll.u32 %v1811_v50, 16  ;;  %v1834_v3 = vsel %vm603_vm0, %v625_v53, %v626_v58  ;;  %v669_v10 = vshrl.u32 %v1836_v4, 16 }
  0x25   : > { %v581_v63 = vor.u32 %v580_v57, %v576_v51  ;;  %v671_v11 = vshll.u32 %v1836_v4, 16  ;;  %v696_v12 = vrot.slane %v1836_v4, 1  ;;  %v676_v14 = vshll.u32 %v1603_v7, 16 }
  0x26   : > { %v697_v15 = vrot.slane %v1603_v7, 1  ;;  %v615_v16 = vsel %vm603_vm0, %v613_v59, %v614_v60  ;;  %v740_v19 = vshrl.u32 %v1842_v8, 16  ;;  %v742_v20 = vshll.u32 %v1842_v8, 16 }
  0x27   : > { %701 = vrot.lane.b32.xlu1 %v1785_v34, %s1652_s15  ;;  %589 = vrot.lane.b32.xlu0 %v514_v40, %s1653_s16  ;;  %v1845_v9 = vsel %vm490_vm1, %v581_v63, %v585_v61  ;;  %v673_v17 = vrot.slane %v671_v11, 1  ;;  %v678_v21 = vrot.slane %v676_v14, 1  ;;  %v767_v23 = vrot.slane %v1842_v8, 1 }
  0x28   : > { %v1858_v22 = vsel %vm603_vm0, %v696_v12, %v697_v15  ;;  %v744_v26 = vrot.slane %v742_v20, 1  ;;  %v747_v27 = vshll.u32 %v1605_v18, 16  ;;  %v768_v28 = vrot.slane %v1605_v18, 1 }
  0x29   : > { %v674_v25 = vor.u32 %v673_v17, %v669_v10  ;;  %v961_v29 = vsel %vm959_vm2, %v1606_v5, 0  ;;  %v540_v35 = vshrl.u32 %v1811_v50, 16  ;;  %v544_v36 = vrot.slane %v542_v62, 1 }
  0x2a   : > { %v745_v31 = vor.u32 %v744_v26, %v740_v19  ;;  %v749_v32 = vrot.slane %v747_v27, 1  ;;  %v1870_v33 = vsel %vm603_vm0, %v767_v23, %v768_v28  ;;  %1506 = vmatpush3.bf16.msra.mxu0 %v961_v29  ;;  %v547_v37 = vshll.u32 %v1595_v13, 16  ;;  %1530 = vmatpush3.bf16.msra.mxu1 %v961_v29 }
  0x2b   : > { %682 = vrot.lane.b32.xlu1 %v526_v43, %s1654_s18  ;;  %680 = vrot.lane.b32.xlu0 %v514_v40, %s1654_s18  ;;  %v1867_v30 = vsel %vm490_vm1, %v674_v25, %v678_v21  ;;  %v545_v40 = vor.u32 %v544_v36, %v540_v35  ;;  %v616_v47 = vrot.slane %v1811_v50, 1  ;;  %v617_v48 = vrot.slane %v1595_v13, 1 }
  0x2c   : > { %1507 = vmatprep.subr.bf16.mxu0 %v1607_v24  ;;  %v1878_v39 = vsel %vm490_vm1, %v745_v31, %v749_v32  ;;  %1528 = vmatprep.subr.bf16.mxu1 %v1607_v24  ;;  %v554_v49 = vshll.u32 %v1884_v44, 16  ;;  %v552_v52 = vshrl.u32 %v1884_v44, 16  ;;  %v619_v59 = vrot.slane %v1884_v44, 1 }
  0x2d   : > { %v618_v51 = vsel %vm603_vm0, %v616_v47, %v617_v48  ;;  %v566_v61 = vshll.u32 %v1792_v41, 16  ;;  %v564_v63 = vshrl.u32 %v1792_v41, 16  ;;  %v571_v7 = vshll.u32 %v1804_v46, 16 }
  0x2e   : > { %1508 = vmatpush3.bf16.msra.mxu0 %v1607_v24  ;;  %1531 = vmatpush3.bf16.msra.mxu1 %v1607_v24  ;;  %v556_v53 = vrot.slane %v554_v49, 1 }
  0x2f   : > { %753 = vrot.lane.b32.xlu1 %v1818_v54, %s1655_s7  ;;  %751 = vrot.lane.b32.xlu0 %v526_v43, %s1655_s7  ;;  %v568_v5 = vrot.slane %v566_v61, 1  ;;  %v573_v11 = vrot.slane %v571_v7, 1 }
  0x30   : > { %1509 = vmatprep.subr.bf16.mxu0 %v1608_v38  ;;  %1529 = vmatprep.subr.bf16.mxu1 %v1608_v38  ;;  %v557_v57 = vor.u32 %v556_v53, %v552_v52 }
  0x31   : > { %v569_v10 = vor.u32 %v568_v5, %v564_v63 }
  0x32   : > { %1510 = vmatpush3.bf16.msra.mxu0 %v1608_v38  ;;  %1532 = vmatpush3.bf16.msra.mxu1 %v1608_v38 }
  0x33   : > { %591 = vrot.lane.b32.xlu1 %v526_v43, %s1653_s16  ;;  %770 = vrot.lane.b32.xlu0 %v1785_v34, %s1656_s9  ;;  %v549_v43 = vrot.slane %v547_v37, 1  ;;  %v574_v12 = vsel %vm490_vm1, %v569_v10, %v573_v11 }
  0x35   : > { %v550_v45 = vsel %vm490_vm1, %v545_v40, %v549_v43 }
  0x37   : > { %593 = vrot.lane.b32.xlu1 %v1818_v54, %s1653_s16  ;;  %772 = vrot.lane.b32.xlu0 %v615_v16, %s1656_s9 }
  0x3b   : > { %634 = vrot.lane.b32.xlu1 %v615_v16, %s1651_s14  ;;  %632 = vrot.lane.b32.xlu0 %v1785_v34, %s1651_s14  ;;  %v1597_v34 = vld [vmem:[%s1737_s10 + $0x44] ss:$0 sps:$4 sm:$0x11]   ;;  %s1415_s10 = sshll.u32 %s2166_s26, 1  ;;  %s1418_s26 = sshll.u32 %s2162_s22, 1 }
  0x3c   : > { %v559_v56 = vshll.u32 %v1597_v34, 16  ;;  %v620_v60 = vrot.slane %v1597_v34, 1  ;;  %s392_s27 = sadd.s32 %s1418_s26, %s2168_s21 }
  0x3d   : > { %s1419_s29 = sshll.u32 %s392_s27, 1 }
  0x3e   : > { %v561_v58 = vrot.slane %v559_v56, 1  ;;  %v621_v62 = vsel %vm603_vm0, %v619_v59, %v620_v60  ;;  %s394_s28 = scalar_lea.vmem %s2150_s6, %s1419_s29 }
  0x3f   : > { %655 = vrot.lane.b32.xlu1 %v1811_v50, %s1649_s11  ;;  %653 = vrot.lane.b32.xlu0 %v1748_v2, %s1649_s11 }
  0x43   : > { %686 = vrot.lane.b32.xlu1 %v550_v45, %s1654_s18  ;;  %684 = vrot.lane.b32.xlu0 %v1818_v54, %s1654_s18  ;;  %v562_v54 = vsel %vm490_vm1, %v557_v57, %v561_v58 }
  0x47   : > { %705 = vrot.lane.b32.xlu1 %v618_v51, %s1652_s15  ;;  %703 = vrot.lane.b32.xlu0 %v615_v16, %s1652_s15 }
  0x4b   : > { %726 = vrot.lane.b32.xlu1 %v1884_v44, %s1650_s12  ;;  %724 = vrot.lane.b32.xlu0 %v1811_v50, %s1650_s12 }
  0x4f   : > { %757 = vrot.lane.b32.xlu1 %v562_v54, %s1655_s7  ;;  %755 = vrot.lane.b32.xlu0 %v550_v45, %s1655_s7 }
  0x53   : > { %595 = vrot.lane.b32.xlu1 %v550_v45, %s1653_s16  ;;  %774 = vrot.lane.b32.xlu0 %v618_v51, %s1656_s9 }
  0x57   : > { %597 = vrot.lane.b32.xlu1 %v562_v54, %s1653_s16  ;;  %776 = vrot.lane.b32.xlu0 %v621_v62, %s1656_s9 }
  0x5b   : > { %638 = vrot.lane.b32.xlu1 %v621_v62, %s1651_s14  ;;  %636 = vrot.lane.b32.xlu0 %v618_v51, %s1651_s14 }
  0x5f   : > { %659 = vrot.lane.b32.xlu1 %v1792_v41, %s1649_s11  ;;  %657 = vrot.lane.b32.xlu0 %v1884_v44, %s1649_s11 }
  0x63   : > { %690 = vrot.lane.b32.xlu1 %v574_v12, %s1654_s18  ;;  %688 = vrot.lane.b32.xlu0 %v562_v54, %s1654_s18 }
  0x67   : > { %709 = vrot.lane.b32.xlu1 %v1821_v55, %s1652_s15  ;;  %707 = vrot.lane.b32.xlu0 %v621_v62, %s1652_s15 }
  0x6b   : > { %730 = vrot.lane.b32.xlu1 %v1799_v42, %s1650_s12  ;;  %728 = vrot.lane.b32.xlu0 %v1792_v41, %s1650_s12 }
  0x6f   : > { %761 = vrot.lane.b32.xlu1 %v1845_v9, %s1655_s7  ;;  %759 = vrot.lane.b32.xlu0 %v574_v12, %s1655_s7 }
  0x73   : > { %599 = vrot.lane.b32.xlu1 %v574_v12, %s1653_s16  ;;  %778 = vrot.lane.b32.xlu0 %v1821_v55, %s1656_s9 }
  0x77   : > { %601 = vrot.lane.b32.xlu1 %v1845_v9, %s1653_s16  ;;  %780 = vrot.lane.b32.xlu0 %v1834_v3, %s1656_s9 }
  0x7b   : > { %642 = vrot.lane.b32.xlu1 %v1834_v3, %s1651_s14  ;;  %640 = vrot.lane.b32.xlu0 %v1821_v55, %s1651_s14 }
  0x7f   : > { %663 = vrot.lane.b32.xlu1 %v1836_v4, %s1649_s11  ;;  %661 = vrot.lane.b32.xlu0 %v1799_v42, %s1649_s11  ;;  %s1416_s11 = sshll.u32 %s2162_s22, 5 }
  0x83   : > { %694 = vrot.lane.b32.xlu1 %v1867_v30, %s1654_s18  ;;  %692 = vrot.lane.b32.xlu0 %v1845_v9, %s1654_s18 }
  0x87   : > { %713 = vrot.lane.b32.xlu1 %v1858_v22, %s1652_s15  ;;  %711 = vrot.lane.b32.xlu0 %v1834_v3, %s1652_s15 }
  0x89   : > { %v652_v46 = vpop.permute.xlu1 %651  ;;  %v650_v55 = vpop.permute.xlu0 %649 }
  0x8b   : > { %734 = vrot.lane.b32.xlu1 %v1842_v8, %s1650_s12  ;;  %732 = vrot.lane.b32.xlu0 %v1836_v4, %s1650_s12  ;;  %s383_s12 = sadd.s32 %s1416_s11, %s1415_s10 }
  0x8c   : > { %s1417_s14 = sshll.u32 %s383_s12, 2 }
  0x8d   : > { %v723_v13 = vpop.permute.xlu1 %722  ;;  %v721_v14 = vpop.permute.xlu0 %720  ;;  %s2057_s18 = scalar_lea.vmem %s2149_s5, %s1417_s14 }
  0x8f   : > { %765 = vrot.lane.b32.xlu1 %v1878_v39, %s1655_s7  ;;  %763 = vrot.lane.b32.xlu0 %v1867_v30, %s1655_s7 }
  0x91   : > { %v629_v9 = vpop.permute.xlu1 %628  ;;  %v700_v15 = vpop.permute.xlu0 %699 }
  0x93   : > { %784 = vrot.lane.b32.xlu1 %v1870_v33, %s1656_s9  ;;  %782 = vrot.lane.b32.xlu0 %v1858_v22, %s1656_s9 }
  0x95   : > { %v631_v3 = vpop.permute.xlu1 %630  ;;  %v588_v8 = vpop.permute.xlu0 %587 }
  0x96   : > { %v788_v4 = vsel %vm786_vm3, %v1755_v6, %v588_v8 }
  0x97   : > { %v805_v18 = vsel %vm803_vm4, %v788_v4, %v629_v9 }
  0x98   : > { %v822_v23 = vsel %vm820_vm5, %v805_v18, %v650_v55 }
  0x99   : > { %v702_v16 = vpop.permute.xlu1 %701  ;;  %v590_v17 = vpop.permute.xlu0 %589 }
  0x9a   : > { %v790_v19 = vsel %vm786_vm3, %v1743_v1, %v590_v17 }
  0x9b   : > { %v807_v20 = vsel %vm803_vm4, %v790_v19, %v631_v3 }
  0x9c   : > { %v824_v22 = vsel %vm820_vm5, %v807_v20, %v652_v46 }
  0x9d   : > { %v683_v21 = vpop.permute.xlu1 %682  ;;  %v681_v24 = vpop.permute.xlu0 %680 }
  0x9e   : > { %v839_v6 = vsel %vm837_vm6, %v822_v23, %v681_v24  ;;  %v841_v26 = vsel %vm837_vm6, %v824_v22, %v683_v21 }
  0x9f   : > { %v856_v25 = vsel %vm854_vm7, %v839_v6, %v700_v15  ;;  %v858_v29 = vsel %vm854_vm7, %v841_v26, %v702_v16 }
  0xa0   : > { %v873_v28 = vsel %vm871_vm8, %v856_v25, %v721_v14  ;;  %v875_v33 = vsel %vm871_vm8, %v858_v29, %v723_v13 }
  0xa1   : > { %v754_v27 = vpop.permute.xlu1 %753  ;;  %v752_v1 = vpop.permute.xlu0 %751 }
  0xa2   : > { %v890_v31 = vsel %vm888_vm9, %v873_v28, %v752_v1  ;;  %v892_v37 = vsel %vm888_vm9, %v875_v33, %v754_v27 }
  0xa5   : > { %v592_v30 = vpop.permute.xlu1 %591  ;;  %v771_v32 = vpop.permute.xlu0 %770 }
  0xa6   : > { %v907_v35 = vsel %vm905_vm10, %v890_v31, %v771_v32  ;;  %v792_v56 = vsel %vm786_vm3, %v1740_v0, %v592_v30 }
  0xa7   : > { %1511 = vmatprep.mubr.msk.bf16.mxu0 %vm942_vm11, %v907_v35 }
  0xa9   : > { %v594_v36 = vpop.permute.xlu1 %593  ;;  %v773_v38 = vpop.permute.xlu0 %772 }
  0xaa   : > { %v909_v39 = vsel %vm905_vm10, %v892_v37, %v773_v38  ;;  %v794_v61 = vsel %vm786_vm3, %v1748_v2, %v594_v36 }
  0xab   : > { %1512 = vmatmul.mubr.msk.bf16.vlgmr.msra.gmra.mxu0 %vm942_vm11, %v909_v39 }
  0xad   : > { %v635_v40 = vpop.permute.xlu1 %634  ;;  %v633_v43 = vpop.permute.xlu0 %632 }
  0xae   : > { %v809_v57 = vsel %vm803_vm4, %v792_v56, %v633_v43  ;;  %v811_v63 = vsel %vm803_vm4, %v794_v61, %v635_v40 }
  0xb1   : > { %v656_v45 = vpop.permute.xlu1 %655  ;;  %v654_v47 = vpop.permute.xlu0 %653 }
  0xb2   : > { %v826_v54 = vsel %vm820_vm5, %v809_v57, %v654_v47  ;;  %v828_v0 = vsel %vm820_vm5, %v811_v63, %v656_v45 }
  0xb5   : > { %v687_v48 = vpop.permute.xlu1 %686  ;;  %v685_v34 = vpop.permute.xlu0 %684 }
  0xb6   : > { %v843_v60 = vsel %vm837_vm6, %v826_v54, %v685_v34  ;;  %v845_v12 = vsel %vm837_vm6, %v828_v0, %v687_v48 }
  0xb9   : > { %v706_v49 = vpop.permute.xlu1 %705  ;;  %v704_v51 = vpop.permute.xlu0 %703 }
  0xba   : > { %v860_v62 = vsel %vm854_vm7, %v843_v60, %v704_v51  ;;  %v862_v55 = vsel %vm854_vm7, %v845_v12, %v706_v49 }
  0xbd   : > { %v727_v52 = vpop.permute.xlu1 %726  ;;  %v725_v53 = vpop.permute.xlu0 %724 }
  0xbe   : > { %v877_v5 = vsel %vm871_vm8, %v860_v62, %v725_v53  ;;  %v879_v2 = vsel %vm871_vm8, %v862_v55, %v727_v52 }
  0xc1   : > { %v758_v58 = vpop.permute.xlu1 %757  ;;  %v756_v59 = vpop.permute.xlu0 %755 }
  0xc2   : > { %v894_v10 = vsel %vm888_vm9, %v877_v5, %v756_v59  ;;  %v896_v14 = vsel %vm888_vm9, %v879_v2, %v758_v58 }
  0xc5   : > { %v596_v7 = vpop.permute.xlu1 %595  ;;  %v775_v11 = vpop.permute.xlu0 %774 }
  0xc6   : > { %v911_v46 = vsel %vm905_vm10, %v894_v10, %v775_v11  ;;  %v796_v23 = vsel %vm786_vm3, %v1811_v50, %v596_v7 }
  0xc7   : > { %1515 = vmatprep.mubr.msk.bf16.mxu0 %vm942_vm11, %v911_v46 }
  0xc9   : > { %v598_v13 = vpop.permute.xlu1 %597  ;;  %v777_v9 = vpop.permute.xlu0 %776 }
  0xca   : > { %v913_v15 = vsel %vm905_vm10, %v896_v14, %v777_v9  ;;  %v798_v1 = vsel %vm786_vm3, %v1884_v44, %v598_v13 }
  0xcb   : > { %1516 = vmatmul.mubr.msk.bf16.gmra.mxu0 %vm942_vm11, %v913_v15 }
  0xcd   : > { %v639_v3 = vpop.permute.xlu1 %638  ;;  %v637_v8 = vpop.permute.xlu0 %636 }
  0xce   : > { %v813_v24 = vsel %vm803_vm4, %v796_v23, %v637_v8  ;;  %v815_v29 = vsel %vm803_vm4, %v798_v1, %v639_v3 }
  0xd1   : > { %v660_v4 = vpop.permute.xlu1 %659  ;;  %v658_v16 = vpop.permute.xlu0 %657 }
  0xd2   : > { %v830_v25 = vsel %vm820_vm5, %v813_v24, %v658_v16  ;;  %v832_v50 = vsel %vm820_vm5, %v815_v29, %v660_v4 }
  0xd5   : > { %v691_v17 = vpop.permute.xlu1 %690  ;;  %v689_v18 = vpop.permute.xlu0 %688 }
  0xd6   : > { %v847_v27 = vsel %vm837_vm6, %v830_v25, %v689_v18  ;;  %v849_v35 = vsel %vm837_vm6, %v832_v50, %v691_v17 }
  0xd9   : > { %v710_v19 = vpop.permute.xlu1 %709  ;;  %v708_v20 = vpop.permute.xlu0 %707 }
  0xda   : > { %v864_v28 = vsel %vm854_vm7, %v847_v27, %v708_v20  ;;  %v866_v37 = vsel %vm854_vm7, %v849_v35, %v710_v19 }
  0xdd   : > { %v731_v21 = vpop.permute.xlu1 %730  ;;  %v729_v22 = vpop.permute.xlu0 %728 }
  0xde   : > { %v881_v30 = vsel %vm871_vm8, %v864_v28, %v729_v22  ;;  %v883_v44 = vsel %vm871_vm8, %v866_v37, %v731_v21 }
  0xe1   : > { %v762_v6 = vpop.permute.xlu1 %761  ;;  %v760_v26 = vpop.permute.xlu0 %759 }
  0xe2   : > { %v898_v32 = vsel %vm888_vm9, %v881_v30, %v760_v26  ;;  %v900_v39 = vsel %vm888_vm9, %v883_v44, %v762_v6 }
  0xe5   : > { %v600_v31 = vpop.permute.xlu1 %599  ;;  %v779_v33 = vpop.permute.xlu0 %778 }
  0xe6   : > { %v915_v36 = vsel %vm905_vm10, %v898_v32, %v779_v33  ;;  %v800_v54 = vsel %vm786_vm3, %v1792_v41, %v600_v31 }
  0xe7   : > { %1519 = vmatprep.mubr.msk.bf16.mxu1 %vm942_vm11, %v915_v36 }
  0xe9   : > { %v602_v38 = vpop.permute.xlu1 %601  ;;  %v781_v40 = vpop.permute.xlu0 %780 }
  0xea   : > { %v917_v43 = vsel %vm905_vm10, %v900_v39, %v781_v40  ;;  %v802_v58 = vsel %vm786_vm3, %v1799_v42, %v602_v38 }
  0xeb   : > { %1520 = vmatmul.mubr.msk.bf16.vlgmr.msra.gmra.mxu1 %vm942_vm11, %v917_v43 }
  0xed   : > { %v643_v45 = vpop.permute.xlu1 %642  ;;  %v641_v47 = vpop.permute.xlu0 %640 }
  0xee   : > { %v819_v59 = vsel %vm803_vm4, %v802_v58, %v643_v45  ;;  %v817_v60 = vsel %vm803_vm4, %v800_v54, %v641_v47 }
  0xf1   : > { %v664_v48 = vpop.permute.xlu1 %663  ;;  %v662_v34 = vpop.permute.xlu0 %661 }
  0xf2   : > { %v836_v61 = vsel %vm820_vm5, %v819_v59, %v664_v48  ;;  %v834_v63 = vsel %vm820_vm5, %v817_v60, %v662_v34 }
  0xf5   : > { %v695_v49 = vpop.permute.xlu1 %694  ;;  %v693_v51 = vpop.permute.xlu0 %692 }
  0xf6   : > { %v853_v5 = vsel %vm837_vm6, %v836_v61, %v695_v49  ;;  %v851_v0 = vsel %vm837_vm6, %v834_v63, %v693_v51 }
  0xf9   : > { %v714_v52 = vpop.permute.xlu1 %713  ;;  %v712_v53 = vpop.permute.xlu0 %711 }
  0xfa   : > { %v870_v42 = vsel %vm854_vm7, %v853_v5, %v714_v52  ;;  %v868_v41 = vsel %vm854_vm7, %v851_v0, %v712_v53 }
  0xfd   : > { %v735_v56 = vpop.permute.xlu1 %734  ;;  %v733_v57 = vpop.permute.xlu0 %732 }
  0xfe   : > { %v887_v10 = vsel %vm871_vm8, %v870_v42, %v735_v56  ;;  %v885_v11 = vsel %vm871_vm8, %v868_v41, %v733_v57 }
 0x101   : > { %v766_v62 = vpop.permute.xlu1 %765  ;;  %v764_v7 = vpop.permute.xlu0 %763 }
 0x102   : > { %v904_v12 = vsel %vm888_vm9, %v887_v10, %v766_v62  ;;  %v902_v55 = vsel %vm888_vm9, %v885_v11, %v764_v7 }
 0x105   : > { %v785_v46 = vpop.permute.xlu1 %784  ;;  %v783_v13 = vpop.permute.xlu0 %782 }
 0x106   : > { %v921_v2 = vsel %vm905_vm10, %v904_v12, %v785_v46  ;;  %v919_v14 = vsel %vm905_vm10, %v902_v55, %v783_v13 }
 0x107   : > { %1523 = vmatprep.mubr.msk.bf16.mxu1 %vm942_vm11, %v919_v14 }
 0x108   : > { %1524 = vmatmul.mubr.msk.bf16.gmra.mxu1 %vm942_vm11, %v921_v2 }
 0x16b   : > { %v1513_v9 = vpop.f32.mrf.mxu0 }
 0x16c   : > { %v1478_v15 = vpack.c.bf16 %v1513_v9, %v1513_v9  ;;  %v1180_v18 = vmul.f32 %v1513_v9, %v1513_v9  ;;  %v1144_v6 = vsel %vm803_vm4, %v1513_v9, 0.0 }
 0x16d   : > { %v997_v3 = vpop.f32.mrf.mxu0 }
 0x16e   : > { %1127 = vst.msk [vmem:[%s2057_s18 + $0x8] sm:$0xf] %vm1124_vm12, %v1478_v15  ;;  %v1476_v8 = vpack.c.bf16 %v997_v3, %v997_v3  ;;  %v1178_v16 = vmul.f32 %v997_v3, %v997_v3  ;;  %v1141_v20 = vsel %vm803_vm4, %v997_v3, 0.0  ;;  %v1197_v29 = vsel %vm803_vm4, %v1180_v18, 0.0 }
 0x16f   : > { %v1514_v4 = vpop.f32.mrf.mxu0 }
 0x170   : > { %1125 = vst.msk [vmem:[%s2057_s18] sm:$0xf] %vm1124_vm12, %v1476_v8  ;;  %v1479_v17 = vpack.c.bf16 %v1514_v4, %v1514_v4  ;;  %v1194_v25 = vsel %vm803_vm4, %v1178_v16, 0.0  ;;  %v1181_v26 = vmul.f32 %v1514_v4, %v1514_v4  ;;  %v1146_v30 = vsel %vm803_vm4, %v1514_v4, 0.0 }
 0x171   : > { %v1000_v19 = vpop.f32.mrf.mxu0 }
 0x172   : > { %1128 = vst.msk [vmem:[%s2057_s18 + $0xc] sm:$0xf] %vm1124_vm12, %v1479_v17  ;;  %v1477_v21 = vpack.c.bf16 %v1000_v19, %v1000_v19  ;;  %v1142_v22 = vsel %vm803_vm4, %v1000_v19, 0.0  ;;  %v1179_v23 = vmul.f32 %v1000_v19, %v1000_v19  ;;  %v1199_v32 = vsel %vm803_vm4, %v1181_v26, 0.0 }
 0x173   : > { %v1143_v24 = vadd.f32 %v1142_v22, %v1141_v20 }
 0x174   : > { %1126 = vst.msk [vmem:[%s2057_s18 + $0x4] sm:$0xf] %vm1124_vm12, %v1477_v21  ;;  %v1195_v27 = vsel %vm803_vm4, %v1179_v23, 0.0 }
 0x175   : > { %v1145_v1 = vadd.f32 %v1144_v6, %v1143_v24  ;;  %v1196_v28 = vadd.f32 %v1195_v27, %v1194_v25 }
 0x177   : > { %v1198_v31 = vadd.f32 %v1197_v29, %v1196_v28  ;;  %v1147_v50 = vadd.f32 %v1146_v30, %v1145_v1 }
 0x179   : > { %v1200_v33 = vadd.f32 %v1199_v32, %v1198_v31 }
 0x18b   : > { %v1517_v35 = vpop.f32.mrf.mxu0 }
 0x18c   : > { %v1482_v36 = vpack.c.bf16 %v1517_v35, %v1517_v35  ;;  %v1184_v5 = vmul.f32 %v1517_v35, %v1517_v35  ;;  %v1152_v0 = vsel %vm803_vm4, %v1517_v35, 0.0 }
 0x18d   : > { %v1013_v37 = vpop.f32.mrf.mxu0 }
 0x18e   : > { %1131 = vst.msk [vmem:[%s2057_s18 + $0x18] sm:$0xf] %vm1124_vm12, %v1482_v36  ;;  %v1480_v44 = vpack.c.bf16 %v1013_v37, %v1013_v37  ;;  %v1182_v52 = vmul.f32 %v1013_v37, %v1013_v37  ;;  %v1148_v57 = vsel %vm803_vm4, %v1013_v37, 0.0  ;;  %v1205_v41 = vsel %vm803_vm4, %v1184_v5, 0.0 }
 0x18f   : > { %v1518_v38 = vpop.f32.mrf.mxu0  ;;  %v1149_v60 = vadd.f32 %v1148_v57, %v1147_v50 }
 0x190   : > { %1129 = vst.msk [vmem:[%s2057_s18 + $0x10] sm:$0xf] %vm1124_vm12, %v1480_v44  ;;  %v1483_v39 = vpack.c.bf16 %v1518_v38, %v1518_v38  ;;  %v1201_v54 = vsel %vm803_vm4, %v1182_v52, 0.0  ;;  %v1185_v10 = vmul.f32 %v1518_v38, %v1518_v38  ;;  %v1154_v46 = vsel %vm803_vm4, %v1518_v38, 0.0 }
 0x191   : > { %v1016_v40 = vpop.f32.mrf.mxu0  ;;  %v1202_v62 = vadd.f32 %v1201_v54, %v1200_v33 }
 0x192   : > { %1132 = vst.msk [vmem:[%s2057_s18 + $0x1c] sm:$0xf] %vm1124_vm12, %v1483_v39  ;;  %v1481_v43 = vpack.c.bf16 %v1016_v40, %v1016_v40  ;;  %v1183_v58 = vmul.f32 %v1016_v40, %v1016_v40  ;;  %v1150_v59 = vsel %vm803_vm4, %v1016_v40, 0.0  ;;  %v1207_v14 = vsel %vm803_vm4, %v1185_v10, 0.0 }
 0x193   : > { %v1151_v63 = vadd.f32 %v1150_v59, %v1149_v60 }
 0x194   : > { %1130 = vst.msk [vmem:[%s2057_s18 + $0x14] sm:$0xf] %vm1124_vm12, %v1481_v43  ;;  %v1203_v61 = vsel %vm803_vm4, %v1183_v58, 0.0 }
 0x195   : > { %v1204_v7 = vadd.f32 %v1203_v61, %v1202_v62  ;;  %v1153_v42 = vadd.f32 %v1152_v0, %v1151_v63 }
 0x197   : > { %v1206_v12 = vadd.f32 %v1205_v41, %v1204_v7  ;;  %v1155_v13 = vadd.f32 %v1154_v46, %v1153_v42 }
 0x199   : > { %v1208_v8 = vadd.f32 %v1207_v14, %v1206_v12 }
 0x1ab   : > { %v1521_v45 = vpop.f32.mrf.mxu1 }
 0x1ac   : > { %v1486_v47 = vpack.c.bf16 %v1521_v45, %v1521_v45  ;;  %v1188_v18 = vmul.f32 %v1521_v45, %v1521_v45  ;;  %v1160_v20 = vsel %vm803_vm4, %v1521_v45, 0.0 }
 0x1ad   : > { %v1029_v48 = vpop.f32.mrf.mxu1 }
 0x1ae   : > { %1135 = vst.msk [vmem:[%s2057_s18 + $0x28] sm:$0xf] %vm1124_vm12, %v1486_v47  ;;  %v1484_v34 = vpack.c.bf16 %v1029_v48, %v1029_v48  ;;  %v1186_v11 = vmul.f32 %v1029_v48, %v1029_v48  ;;  %v1156_v55 = vsel %vm803_vm4, %v1029_v48, 0.0  ;;  %v1213_v23 = vsel %vm803_vm4, %v1188_v18, 0.0 }
 0x1af   : > { %v1522_v49 = vpop.f32.mrf.mxu1  ;;  %v1157_v3 = vadd.f32 %v1156_v55, %v1155_v13 }
 0x1b0   : > { %1133 = vst.msk [vmem:[%s2057_s18 + $0x20] sm:$0xf] %vm1124_vm12, %v1484_v34  ;;  %v1487_v51 = vpack.c.bf16 %v1522_v49, %v1522_v49  ;;  %v1209_v9 = vsel %vm803_vm4, %v1186_v11, 0.0  ;;  %v1189_v24 = vmul.f32 %v1522_v49, %v1522_v49  ;;  %v1162_v27 = vsel %vm803_vm4, %v1522_v49, 0.0 }
 0x1b1   : > { %v1032_v53 = vpop.f32.mrf.mxu1  ;;  %v1210_v16 = vadd.f32 %v1209_v9, %v1208_v8 }
 0x1b2   : > { %1136 = vst.msk [vmem:[%s2057_s18 + $0x2c] sm:$0xf] %vm1124_vm12, %v1487_v51  ;;  %v1485_v56 = vpack.c.bf16 %v1032_v53, %v1032_v53  ;;  %v1187_v2 = vmul.f32 %v1032_v53, %v1032_v53  ;;  %v1158_v15 = vsel %vm803_vm4, %v1032_v53, 0.0  ;;  %v1215_v50 = vsel %vm803_vm4, %v1189_v24, 0.0 }
 0x1b3   : > { %v1159_v17 = vadd.f32 %v1158_v15, %v1157_v3 }
 0x1b4   : > { %1134 = vst.msk [vmem:[%s2057_s18 + $0x24] sm:$0xf] %vm1124_vm12, %v1485_v56  ;;  %v1211_v4 = vsel %vm803_vm4, %v1187_v2, 0.0 }
 0x1b5   : > { %v1212_v19 = vadd.f32 %v1211_v4, %v1210_v16  ;;  %v1161_v21 = vadd.f32 %v1160_v20, %v1159_v17 }
 0x1b7   : > { %v1214_v25 = vadd.f32 %v1213_v23, %v1212_v19  ;;  %v1163_v30 = vadd.f32 %v1162_v27, %v1161_v21 }
 0x1b9   : > { %v1216_v36 = vadd.f32 %v1215_v50, %v1214_v25 }
 0x1c8   : > { %v1525_v22 = vpop.f32.mrf.mxu1 }
 0x1c9   : > { %v1490_v6 = vpack.c.bf16 %v1525_v22, %v1525_v22  ;;  %v1192_v44 = vmul.f32 %v1525_v22, %v1525_v22  ;;  %v1168_v47 = vsel %vm803_vm4, %v1525_v22, 0.0 }
 0x1ca   : > { %v1045_v26 = vpop.f32.mrf.mxu1 }
 0x1cb   : > { %1139 = vst.msk [vmem:[%s2057_s18 + $0x38] sm:$0xf] %vm1124_vm12, %v1490_v6  ;;  %v1488_v1 = vpack.c.bf16 %v1045_v26, %v1045_v26  ;;  %v1164_v28 = vsel %vm803_vm4, %v1045_v26, 0.0  ;;  %v1190_v29 = vmul.f32 %v1045_v26, %v1045_v26  ;;  %v1221_v52 = vsel %vm803_vm4, %v1192_v44, 0.0 }
 0x1cc   : > { %v1526_v31 = vpop.f32.mrf.mxu1  ;;  %v1165_v35 = vadd.f32 %v1164_v28, %v1163_v30 }
 0x1cd   : > { %1137 = vst.msk [vmem:[%s2057_s18 + $0x30] sm:$0xf] %vm1124_vm12, %v1488_v1  ;;  %v1217_v32 = vsel %vm803_vm4, %v1190_v29, 0.0  ;;  %v1491_v33 = vpack.c.bf16 %v1526_v31, %v1526_v31  ;;  %v1193_v48 = vmul.f32 %v1526_v31, %v1526_v31  ;;  %v1170_v53 = vsel %vm803_vm4, %v1526_v31, 0.0 }
 0x1ce   : > { %v1048_v37 = vpop.f32.mrf.mxu1  ;;  %v1218_v43 = vadd.f32 %v1217_v32, %v1216_v36 }
 0x1cf   : > { %1140 = vst.msk [vmem:[%s2057_s18 + $0x3c] sm:$0xf] %vm1124_vm12, %v1491_v33  ;;  %v1489_v38 = vpack.c.bf16 %v1048_v37, %v1048_v37  ;;  %v1166_v39 = vsel %vm803_vm4, %v1048_v37, 0.0  ;;  %v1191_v40 = vmul.f32 %v1048_v37, %v1048_v37  ;;  %v1223_v58 = vsel %vm803_vm4, %v1193_v48, 0.0 }
 0x1d0   : > { %v1167_v45 = vadd.f32 %v1166_v39, %v1165_v35 }
 0x1d1   : > { %1138 = vst.msk [vmem:[%s2057_s18 + $0x34] sm:$0xf] %vm1124_vm12, %v1489_v38  ;;  %v1219_v34 = vsel %vm803_vm4, %v1191_v40, 0.0 }
 0x1d2   : > { %v1169_v49 = vadd.f32 %v1168_v47, %v1167_v45  ;;  %v1220_v51 = vadd.f32 %v1219_v34, %v1218_v43 }
 0x1d4   : > { %v1171_v56 = vadd.f32 %v1170_v53, %v1169_v49  ;;  %v1222_v57 = vadd.f32 %v1221_v52, %v1220_v51 }
 0x1d6   : > { %v1172_v54 = vrot.slane %v1171_v56, 4  ;;  %v1224_v59 = vadd.f32 %v1223_v58, %v1222_v57 }
 0x1d8   : > { %v1173_v60 = vadd.f32 %v1172_v54, %v1171_v56  ;;  %v1225_v61 = vrot.slane %v1224_v59, 4 }
 0x1da   : > { %v1174_v62 = vrot.slane %v1173_v60, 2  ;;  %v1226_v63 = vadd.f32 %v1225_v61, %v1224_v59 }
 0x1dc   : > { %v1175_v5 = vadd.f32 %v1174_v62, %v1173_v60  ;;  %v1227_v7 = vrot.slane %v1226_v63, 2 }
 0x1de   : > { %v1176_v0 = vrot.slane %v1175_v5, 1  ;;  %v1228_v42 = vadd.f32 %v1227_v7, %v1226_v63 }
 0x1e0   : > { %v1229_v41 = vrot.slane %v1228_v42, 1  ;;  %v1177_v10 = vadd.f32 %v1176_v0, %v1175_v5 }
 0x1e2   : > { %v1230_v11 = vadd.f32 %v1229_v41, %v1228_v42 }
 0x1e4   : > { %v1232_v12 = vsel %vm1231_vm13, %v1177_v10, %v1230_v11 }
 0x1e5   : > { %1234 = vst.msk [vmem:[%s394_s28] sm:$0x3] %vm1233_vm14, %v1232_v12 }
 0x1e6 PF: > { %s17_s2 = sadd.s32 1, %s1647_s2   ;;  %s2151_s21 = smov %s1639_s23 }
 0x1e7   : > { %p14_p10 = scmp.ge.s32.totalorder %s17_s2, 6   ;;  %s2152_s22 = smov %s1643_s24 }
 0x1e8   : > { %s2153_s23 = smov %s2156_s3  ;;  %s2154_s24 = smov %s2160_s25 }
 0x1e9   :  { %16 = sbr.rel (!%p14_p10) target bundleno = 3 (0x3), region = 85 }

// kernel: encoder_block_forward.5
= control target key start
LH: loop header
LB: loop body
LE: loop exit
PB: predicated region body
PF: predicated region fallthrough
CT: control target
= control target key end

     0   :  { %s657_s15 = smov 0   ;;  %s659_s16 = smov 0   ;;  %s741_s0 = inlined_call_operand.vmem [shape: bf16[2,16,8,16], index: 0, kind: input, shape index: {}]   ;;  %s742_s1 = inlined_call_operand.vmem [shape: f32[1,16], index: 1, kind: input, shape index: {}]   ;;  %s743_s2 = inlined_call_operand.vmem [shape: f32[1,16], index: 2, kind: input, shape index: {}]   ;;  %s744_s3 = inlined_call_operand.vmem [shape: f32[2,16,8,16], index: 3, kind: output, shape index: {0}]   ;;  %s745_s4 = inlined_call_operand.vmem [shape: f32[2,8,8,8], index: 4, kind: output, shape index: {1}]  }
   0x1   :  { %s661_s17 = smov 0   ;;  %s663_s18 = smov 0  }
   0x2   :  { %s665_s19 = smov 0  }
   0x3 LB: > { %s24_s20 = sadd.s32 1, %s621_s17  ;;  %s27_s21 = sadd.s32 1, %s625_s18  ;;  %s629_s19 = sphi %s665_s19, %s15_s19   ;;  %s625_s18 = sphi %s663_s18, %s749_s18   ;;  %s621_s17 = sphi %s661_s17, %s748_s17   ;;  %s617_s16 = sphi %s659_s16, %s747_s16   ;;  %s613_s15 = sphi %s657_s15, %s746_s15  }
   0x4   : > { %p25_p0 = scmp.ge.s32.totalorder %s24_s20, 2  ;;  %p517_p1 = scmp.ge.s32.totalorder %s629_s19, 1 }
   0x5   : > { %p188_p2 = scmp.lt.s32.totalorder %s629_s19, 5 }
   0x6   : > { %s751_s20 = smov (%p25_p0, %s24_s20), 0  ;;  %s753_s21 = smov (!%p25_p0, %s27_s21), %s625_s18 }
   0x7   : > { %p189_p3 = pnand %p517_p1, %p188_p2  ;;  %p29_p4 = scmp.ge.s32.totalorder %s753_s21, 2 }
   0x8   : > { %s518_s22 = sshll.u32 (!%p189_p3), %s613_s15, 3  ;;  %p232_p5 = scmp.lt.s32.totalorder (!%p189_p3), %s617_s16, 1 }
   0x9   : > { %s755_s21 = smov (%p29_p4, %s753_s21), 0  ;;  %192 = sbr.rel (%p189_p3) target bundleno = 160 (0xa0), region = 32 }
   0xa   : > { %p234_p6 = scmp.lt.s32.totalorder (!%p189_p3), %s518_s22, 15  ;;  %s631_s11 = smov (!%p189_p3), 120  }
   0xb   : > { %s524_s12 = sshll.u32 (!%p189_p3), %s613_s15, 2 }
   0xc   : > { %p254_p7 = scmp.lt.s32.totalorder (!%p189_p3), %s524_s12, 7 }
   0xe   : > { %s757_s16 = smov (!%p232_p5, %s617_s16), 1  ;;  %s759_s22 = smov (!%p234_p6, %s518_s22), 15  ;;  %v527_v0 = vld [vmem:[%s742_s1] ss:$0 sm:$0xff]  ;;  %vm315_vm0 = vcmask 130048   ;;  %vm368_vm1 = vcmask 64512  }
   0xf   : > { %s519_s23 = sshll.u32 %s757_s16, 4  ;;  %v528_v9 = vld [vmem:[%s743_s2] ss:$0 sm:$0xff]  ;;  %s761_s12 = smov (!%p254_p7, %s524_s12), 7 }
  0x10   : > { %s693_s24 = sadd.s32 %s519_s23, %s759_s22  ;;  %s525_s13 = sshll.u32 %s757_s16, 3 }
  0x11   : > { %s520_s25 = sshll.u32 %s693_s24, 2  ;;  %s523_s7 = sshll.u32 %s693_s24, 3 }
  0x12   : > { %s239_s28 = scalar_lea.vmem %s741_s0, %s520_s25  ;;  %s249_s10 = scalar_lea.vmem %s744_s3, %s523_s7 }
  0x13   : > { %v547_v1 = vld [vmem:[%s239_s28 + $0x8] sm:$0xff]   ;;  %v532_v2 = vld [vmem:[%s239_s28] sm:$0xff]   ;;  %v548_v3 = vld [vmem:[%s239_s28 + $0x10] sm:$0xff]   ;;  %s257_s14 = sadd.s32 %s525_s13, %s761_s12 }
  0x14   : > { %v537_v4 = vunpack.c.l.bf16 %v547_v1  ;;  %v533_v5 = vunpack.c.l.bf16 %v532_v2  ;;  %v538_v6 = vunpack.c.h.bf16 %v547_v1  ;;  %v534_v7 = vunpack.c.h.bf16 %v532_v2  ;;  %v549_v8 = vld [vmem:[%s239_s28 + $0x18] sm:$0xff]   ;;  %s526_s22 = sshll.u32 %s257_s14, 3 }
  0x15   : > { %v542_v10 = vunpack.c.h.bf16 %v548_v3  ;;  %v541_v11 = vunpack.c.l.bf16 %v548_v3  ;;  %v546_v12 = vunpack.c.h.bf16 %v549_v8  ;;  %v545_v13 = vunpack.c.l.bf16 %v549_v8  ;;  %s259_s25 = scalar_lea.vmem %s745_s4, %s526_s22 }
  0x16   : > { %v286_v14 = vsub.f32 %v537_v4, %v527_v0  ;;  %v284_v15 = vsub.f32 %v533_v5, %v527_v0  ;;  %v287_v16 = vsub.f32 %v538_v6, %v527_v0  ;;  %v285_v17 = vsub.f32 %v534_v7, %v527_v0 }
  0x17   : > { %v289_v18 = vsub.f32 %v542_v10, %v527_v0  ;;  %v288_v19 = vsub.f32 %v541_v11, %v527_v0  ;;  %v291_v20 = vsub.f32 %v546_v12, %v527_v0  ;;  %v290_v21 = vsub.f32 %v545_v13, %v527_v0 }
  0x18   : > { %v301_v22 = vmul.f32 %v528_v9, %v286_v14  ;;  %v299_v23 = vmul.f32 %v528_v9, %v284_v15  ;;  %v302_v24 = vmul.f32 %v528_v9, %v287_v16  ;;  %v300_v25 = vmul.f32 %v528_v9, %v285_v17 }
  0x19   : > { %v304_v26 = vmul.f32 %v528_v9, %v289_v18  ;;  %v303_v27 = vmul.f32 %v528_v9, %v288_v19  ;;  %v306_v28 = vmul.f32 %v528_v9, %v291_v20  ;;  %v305_v29 = vmul.f32 %v528_v9, %v290_v21 }
  0x1a   : > { %v309_v30 = vmax.f32 %v301_v22, 0.0  ;;  %v307_v31 = vmax.f32 %v299_v23, 0.0  ;;  %v310_v32 = vmax.f32 %v302_v24, 0.0  ;;  %v308_v33 = vmax.f32 %v300_v25, 0.0 }
  0x1b   : > { %v312_v34 = vmax.f32 %v304_v26, 0.0  ;;  %v311_v35 = vmax.f32 %v303_v27, 0.0  ;;  %v314_v36 = vmax.f32 %v306_v28, 0.0  ;;  %v313_v37 = vmax.f32 %v305_v29, 0.0 }
  0x1c   : > { %336 = vrot.lane.b32.xlu1 %v309_v30, %s631_s11  ;;  %318 = vst.msk [vmem:[%s249_s10 + $0x10] sm:$0xff] %vm315_vm0, %v309_v30  ;;  %332 = vrot.lane.b32.xlu0 %v307_v31, %s631_s11  ;;  %316 = vst.msk [vmem:[%s249_s10] sm:$0xff] %vm315_vm0, %v307_v31 }
  0x1d   : > { %319 = vst.msk [vmem:[%s249_s10 + $0x18] sm:$0xff] %vm315_vm0, %v310_v32  ;;  %317 = vst.msk [vmem:[%s249_s10 + $0x8] sm:$0xff] %vm315_vm0, %v308_v33 }
  0x1e   : > { %321 = vst.msk [vmem:[%s249_s10 + $0x28] sm:$0xff] %vm315_vm0, %v312_v34  ;;  %320 = vst.msk [vmem:[%s249_s10 + $0x20] sm:$0xff] %vm315_vm0, %v311_v35 }
  0x1f   : > { %323 = vst.msk [vmem:[%s249_s10 + $0x38] sm:$0xff] %vm315_vm0, %v314_v36  ;;  %322 = vst.msk [vmem:[%s249_s10 + $0x30] sm:$0xff] %vm315_vm0, %v313_v37 }
  0x20   : > { %338 = vrot.lane.b32.xlu1 %v310_v32, %s631_s11  ;;  %334 = vrot.lane.b32.xlu0 %v308_v33, %s631_s11 }
  0x24   : > { %342 = vrot.lane.b32.xlu1 %v312_v34, %s631_s11  ;;  %340 = vrot.lane.b32.xlu0 %v311_v35, %s631_s11 }
  0x28   : > { %346 = vrot.lane.b32.xlu1 %v314_v36, %s631_s11  ;;  %344 = vrot.lane.b32.xlu0 %v313_v37, %s631_s11 }
  0x8e   : > { %v337_v38 = vpop.permute.xlu1 %336  ;;  %v333_v39 = vpop.permute.xlu0 %332 }
  0x8f   : > { %v358_v42 = vmax.f32 %v309_v30, %v337_v38  ;;  %v356_v43 = vmax.f32 %v307_v31, %v333_v39 }
  0x92   : > { %v339_v40 = vpop.permute.xlu1 %338  ;;  %v335_v41 = vpop.permute.xlu0 %334 }
  0x93   : > { %v359_v44 = vmax.f32 %v310_v32, %v339_v40  ;;  %v357_v45 = vmax.f32 %v308_v33, %v335_v41 }
  0x95   : > { %v365_v46 = vmax.f32 %v358_v42, %v359_v44  ;;  %v364_v47 = vmax.f32 %v356_v43, %v357_v45 }
  0x96   : > { %v343_v48 = vpop.permute.xlu1 %342  ;;  %v341_v49 = vpop.permute.xlu0 %340 }
  0x97   : > { %370 = vst.msk [vmem:[%s259_s25 + $0x8] sm:$0xff] %vm368_vm1, %v365_v46  ;;  %369 = vst.msk [vmem:[%s259_s25] sm:$0xff] %vm368_vm1, %v364_v47  ;;  %v361_v50 = vmax.f32 %v312_v34, %v343_v48  ;;  %v360_v51 = vmax.f32 %v311_v35, %v341_v49 }
  0x99   : > { %v366_v52 = vmax.f32 %v360_v51, %v361_v50 }
  0x9a   : > { %v347_v53 = vpop.permute.xlu1 %346  ;;  %v345_v54 = vpop.permute.xlu0 %344 }
  0x9b   : > { %371 = vst.msk [vmem:[%s259_s25 + $0x10] sm:$0xff] %vm368_vm1, %v366_v52  ;;  %v363_v55 = vmax.f32 %v314_v36, %v347_v53  ;;  %v362_v56 = vmax.f32 %v313_v37, %v345_v54 }
  0x9d   : > { %v367_v57 = vmax.f32 %v362_v56, %v363_v55 }
  0x9f   : > { %372 = vst.msk [vmem:[%s259_s25 + $0x18] sm:$0xff] %vm368_vm1, %v367_v57 }
  0xa0 PF: > { %s15_s19 = sadd.s32 1, %s629_s19   ;;  %s746_s15 = smov %s621_s17 }
  0xa1   : > { %p12_p8 = scmp.ge.s32.totalorder %s15_s19, 6   ;;  %s747_s16 = smov %s625_s18 }
  0xa2   : > { %s748_s17 = smov %s751_s20  ;;  %s749_s18 = smov %s755_s21 }
  0xa3   :  { %14 = sbr.rel (!%p12_p8) target bundleno = 3 (0x3), region = 74 }

// kernel: encoder_block_forward.4
= control target key start
LH: loop header
LB: loop body
LE: loop exit
PB: predicated region body
PF: predicated region fallthrough
CT: control target
= control target key end

     0   :  { %s2003_s21 = smov 0   ;;  %s2005_s22 = smov 0   ;;  %s2826_s0 = inlined_call_operand.vmem [shape: bf16[2,18,18,8], index: 0, kind: input, shape index: {}, may-alias: {0,1}]   ;;  %s2827_s1 = inlined_call_operand.vmem [shape: bf16[2,18,18,8], index: 1, kind: input, shape index: {}, may-alias: {0,1}]   ;;  %s2828_s2 = inlined_call_operand.vmem [shape: f32[1,8], index: 2, kind: input, shape index: {}]   ;;  %s2829_s3 = inlined_call_operand.vmem [shape: f32[1,8], index: 3, kind: input, shape index: {}]   ;;  %s2830_s4 = inlined_call_operand.vmem [shape: bf16[1,72,8], index: 4, kind: input, shape index: {}]   ;;  %s2831_s5 = inlined_call_operand.vmem [shape: bf16[2,16,16,8], index: 5, kind: output, shape index: {0}]   ;;  %s2832_s6 = inlined_call_operand.vmem [shape: f32[2,2,2,8], index: 6, kind: output, shape index: {1}]  }
   0x1   :  { %s2007_s23 = smov 0   ;;  %s2009_s24 = smov 0  }
   0x2   :  { %s2011_s25 = smov 0  }
   0x3 LB: > { %s26_s26 = sadd.s32 1, %s1950_s23  ;;  %s29_s27 = sadd.s32 1, %s1954_s24  ;;  %s1958_s25 = sphi %s2011_s25, %s17_s25   ;;  %s1954_s24 = sphi %s2009_s24, %s2876_s24   ;;  %s1950_s23 = sphi %s2007_s23, %s2875_s23   ;;  %s1946_s22 = sphi %s2005_s22, %s2874_s22   ;;  %s1942_s21 = sphi %s2003_s21, %s2873_s21  }
   0x4   : > { %p27_p0 = scmp.ge.s32.totalorder %s26_s26, 2  ;;  %p1719_p1 = scmp.ge.s32.totalorder %s1958_s25, 1 }
   0x5   : > { %p275_p2 = scmp.lt.s32.totalorder %s1958_s25, 5 }
   0x6   : > { %s2878_s26 = smov (%p27_p0, %s26_s26), 0  ;;  %s2880_s27 = smov (!%p27_p0, %s29_s27), %s1954_s24 }
   0x7   : > { %p276_p3 = pnand %p1719_p1, %p275_p2  ;;  %p31_p4 = scmp.ge.s32.totalorder %s2880_s27, 2 }
   0x8   : > { %s2036_s28 = sshll.u32 (!%p276_p3), %s1942_s21, 3  ;;  %p346_p5 = scmp.lt.s32.totalorder (!%p276_p3), %s1946_s22, 1 }
   0x9   : > { %s2882_s27 = smov (%p31_p4, %s2880_s27), 0  ;;  %279 = sbr.rel (%p276_p3) target bundleno = 499 (0x1f3), region = 40 }
   0xa   : > { %p348_p6 = scmp.lt.s32.totalorder (!%p276_p3), %s2036_s28, 17  ;;  %s1809_s17 = sadd.s32 (!%p276_p3), 8, %s2036_s28 }
   0xb   : > { %p366_p7 = scmp.lt.s32.totalorder (!%p276_p3), %s1809_s17, 17  ;;  %s1960_s20 = smov (!%p276_p3), 24  }
   0xc   : > { %s1966_s10 = smov (!%p276_p3), 32   ;;  %s1967_s13 = smov (!%p276_p3), 56  }
   0xd   : > { %p379_p8 = scmp.lt.s32.totalorder (!%p276_p3), %s2036_s28, 15  ;;  %p389_p9 = scmp.lt.s32.totalorder (!%p276_p3), %s1942_s21, 1 }
   0xe   : > { %v571_v0 = vlaneseq  ;;  %v2040_v1 = vstv %s2036_s28  ;;  %s2884_s22 = smov (!%p346_p5, %s1946_s22), 1  ;;  %v2073_v9 = vld [vmem:[%s2828_s2] ss:$0 sm:$0xff]  ;;  %s2886_s17 = smov (!%p366_p7, %s1809_s17), 17 }
   0xf   : > { %s349_s29 = scalar_select %p348_p6, %s2036_s28, 17  ;;  %v563_v2 = vadd.s32 2, %v2040_v1  ;;  %v562_v4 = vadd.s32 1, %v2040_v1  ;;  %v564_v5 = vadd.s32 3, %v2040_v1  ;;  %v2057_v7 = vadd.s32 4, %v2040_v1 }
  0x10   : > { %s1865_s30 = smul.u32 54, %s2884_s22  ;;  %v2047_v3 = vshrl.u32 %v571_v0, 7  ;;  %v2060_v8 = vadd.s32 5, %v2040_v1  ;;  %vm575_vm3 = vcmp.ge.s32.totalorder %v2040_v1, 1  ;;  %vm585_vm4 = vcmp.le.s32.totalorder %v2040_v1, 16  ;;  %s2888_s28 = smov (!%p379_p8, %s2036_s28), 15 }
  0x11   : > { %s1864_s7 = smul.u32 3, %s349_s29  ;;  %vm577_vm0 = vcmp.ge.s32.totalorder %v563_v2, 1  ;;  %vm587_vm1 = vcmp.le.s32.totalorder %v563_v2, 16  ;;  %vm576_vm5 = vcmp.ge.s32.totalorder %v562_v4, 1  ;;  %vm586_vm6 = vcmp.le.s32.totalorder %v562_v4, 16  ;;  %s1961_s29 = smov 48  }
  0x12   : > { %v2052_v6 = vadd.s32 16, %v2047_v3  ;;  %vm605_vm2 = vcmp.ge.s32.totalorder %v2047_v3, 1  ;;  %vm578_vm7 = vcmp.ge.s32.totalorder %v564_v5, 1  ;;  %v2076_v10 = vadd.s32 6, %v2040_v1  ;;  %v2090_v21 = vld [vmem:[%s2829_s3] ss:$0 sm:$0xff]  ;;  %vm2094_vm10 = vmand %vm577_vm0, %vm587_vm1 }
  0x13   : > { %s352_s8 = sadd.s32 %s1865_s30, %s1864_s7  ;;  %vm588_vm8 = vcmp.le.s32.totalorder %v564_v5, 16  ;;  %v2083_v14 = vadd.s32 7, %v2040_v1  ;;  %vm2105_vm11 = vmand %vm576_vm5, %vm586_vm6  ;;  %vm910_vm1 = vcmask 1046528   ;;  %s1866_s18 = smul.u32 3, %s2886_s17 }
  0x14   : > { %s1721_s9 = sshll.u32 %s352_s8, 2  ;;  %vm640_vm9 = vcmp.le.s32.totalorder %v2052_v6, 16  ;;  %vm581_vm12 = vcmp.ge.s32.totalorder %v2076_v10, 1  ;;  %vm591_vm13 = vcmp.le.s32.totalorder %v2076_v10, 16  ;;  %vm2116_vm14 = vmand %vm578_vm7, %vm588_vm8  ;;  %s1963_s7 = smov 16  }
  0x15   : > { %s2068_s12 = scalar_lea.vmem %s2826_s0, %s1721_s9  ;;  %vm2127_vm15 = vmand %vm2094_vm10, %vm605_vm2  ;;  %s2181_s19 = sadd.s32 %s1866_s18, %s1865_s30 }
  0x16   : > { %v1810_v11 = vld [vmem:[%s2068_s12 + $0x18] sm:$0xff]   ;;  %v399_v12 = vld [vmem:[%s2068_s12 + $0xc] sm:$0xff]   ;;  %v405_v13 = vld [vmem:[%s2068_s12 + $0x24] sm:$0xff]   ;;  %s1962_s30 = smov 40   ;;  %s1964_s8 = smov 64  }
  0x17   : > { %v1794_v15 = vunpack.c.l.bf16 %v1810_v11  ;;  %v1795_v16 = vunpack.c.h.bf16 %v1810_v11  ;;  %v429_v17 = vunpack.c.l.bf16 %v399_v12  ;;  %v430_v18 = vunpack.c.h.bf16 %v399_v12  ;;  %v401_v19 = vld [vmem:[%s2068_s12 + $0x14] sm:$0x1]  ;;  %v1789_v20 = vld [vmem:[%s2068_s12] sm:$0xff]   ;;  %v398_v32 = vld [vmem:[%s2068_s12 + $0x8] sm:$0x1]  ;;  %s1965_s9 = smov 8  }
  0x18   : > { %v435_v23 = vunpack.c.l.bf16 %v405_v13  ;;  %v436_v24 = vunpack.c.h.bf16 %v405_v13  ;;  %v431_v25 = vunpack.c.l.bf16 %v401_v19  ;;  %v1790_v26 = vunpack.c.l.bf16 %v1789_v20  ;;  %vm2139_vm0 = vmand %vm2105_vm11, %vm605_vm2  ;;  %v404_v52 = vld [vmem:[%s2068_s12 + $0x20] sm:$0x1]  ;;  %s1724_s11 = sshll.u32 %s2181_s19, 2  ;;  %s2890_s21 = smov (!%p389_p9, %s1942_s21), 1 }
  0x19   : > { %v469_v27 = vsub.f32 %v1794_v15, %v2073_v9  ;;  %v470_v28 = vsub.f32 %v1795_v16, %v2073_v9  ;;  %v466_v29 = vsub.f32 %v429_v17, %v2073_v9  ;;  %v467_v30 = vsub.f32 %v430_v18, %v2073_v9  ;;  %vm617_vm5 = vmand %vm2116_vm14, %vm605_vm2  ;;  %s2405_s16 = scalar_lea.vmem %s2827_s1, %s1724_s11 }
  0x1a   : > { %v472_v33 = vsub.f32 %v435_v23, %v2073_v9  ;;  %v473_v34 = vsub.f32 %v436_v24, %v2073_v9  ;;  %v468_v36 = vsub.f32 %v431_v25, %v2073_v9  ;;  %v1791_v37 = vunpack.c.h.bf16 %v1789_v20  ;;  %vm646_vm6 = vmand %vm2105_vm11, %vm640_vm9  ;;  %v423_v22 = vld [vmem:[%s2405_s16 + $0xc] sm:$0xff]  }
  0x1b   : > { %v506_v38 = vmul.f32 %v2090_v21, %v469_v27  ;;  %v507_v39 = vmul.f32 %v2090_v21, %v470_v28  ;;  %v503_v41 = vmul.f32 %v2090_v21, %v466_v29  ;;  %v504_v42 = vmul.f32 %v2090_v21, %v467_v30  ;;  %vm2169_vm7 = vmand %vm575_vm3, %vm585_vm4 }
  0x1c   : > { %v509_v44 = vmul.f32 %v2090_v21, %v472_v33  ;;  %v510_v45 = vmul.f32 %v2090_v21, %v473_v34  ;;  %v505_v46 = vmul.f32 %v2090_v21, %v468_v36  ;;  %v428_v47 = vunpack.c.l.bf16 %v398_v32  ;;  %vm2199_vm4 = vmand %vm2169_vm7, %vm605_vm2 }
  0x1d   : > { %v536_v48 = vmax.f32 %v506_v38, 0.0  ;;  %v537_v49 = vmax.f32 %v507_v39, 0.0  ;;  %v533_v50 = vmax.f32 %v503_v41, 0.0  ;;  %v534_v51 = vmax.f32 %v504_v42, 0.0  ;;  %vm2210_vm8 = vmand %vm2169_vm7, %vm640_vm9  ;;  %v407_v38 = vld [vmem:[%s2068_s12 + $0x2c] sm:$0x1] }
  0x1e   : > { %v539_v53 = vmax.f32 %v509_v44, 0.0  ;;  %v540_v54 = vmax.f32 %v510_v45, 0.0  ;;  %v535_v55 = vmax.f32 %v505_v46, 0.0  ;;  %v463_v56 = vsub.f32 %v1790_v26, %v2073_v9 }
  0x1f   : > { %v737_v57 = vsel %vm2127_vm15, %v536_v48, 0.0  ;;  %v738_v58 = vsel %vm2094_vm10, %v537_v49, 0.0  ;;  %v734_v59 = vsel %vm2139_vm0, %v533_v50, 0.0  ;;  %v735_v60 = vsel %vm2105_vm11, %v534_v51, 0.0  ;;  %vm2222_vm15 = vmand %vm581_vm12, %vm591_vm13 }
  0x20   : > { %v2173_v62 = vpack.c.bf16 %v738_v58, %v737_v57  ;;  %v2175_v63 = vpack.c.bf16 %v735_v60, %v734_v59  ;;  %v740_v0 = vsel %vm617_vm5, %v539_v53, 0.0  ;;  %v741_v2 = vsel %vm2116_vm14, %v540_v54, 0.0  ;;  %vm2232_vm5 = vmand %vm2222_vm15, %vm640_vm9  ;;  %v1811_v58 = vld [vmem:[%s2068_s12 + $0x30] sm:$0xff]  }
  0x21   : > { %v736_v4 = vsel %vm646_vm6, %v535_v55, 0.0  ;;  %v464_v5 = vsub.f32 %v1791_v37, %v2073_v9  ;;  %v465_v11 = vsub.f32 %v428_v47, %v2073_v9  ;;  %vm582_vm3 = vcmp.ge.s32.totalorder %v2083_v14, 1  ;;  %vm2247_vm12 = vmand %vm2094_vm10, %vm640_vm9 }
  0x22   : > { %954 = vrot.lane.b32.xlu1 %v2173_v62, %s1960_s20  ;;  %952 = vrot.lane.b32.xlu0 %v2175_v63, %s1960_s20  ;;  %v2190_v12 = vpack.c.bf16 %v741_v2, %v740_v0  ;;  %v2192_v13 = vpack.c.bf16 %v736_v4, %v736_v4  ;;  %v500_v15 = vmul.f32 %v2090_v21, %v463_v56  ;;  %v434_v17 = vunpack.c.l.bf16 %v404_v52  ;;  %v410_v2 = vld [vmem:[%s2068_s12 + $0x38] sm:$0x1] }
  0x23   : > { %v914_v18 = vrot.slane %v2175_v63, 1  ;;  %v501_v19 = vmul.f32 %v2090_v21, %v464_v5  ;;  %v502_v20 = vmul.f32 %v2090_v21, %v465_v11  ;;  %vm592_vm11 = vcmp.le.s32.totalorder %v2083_v14, 16 }
  0x24   : > { %v915_v24 = vrot.slane %v2192_v13, 1  ;;  %v530_v25 = vmax.f32 %v500_v15, 0.0  ;;  %v471_v26 = vsub.f32 %v434_v17, %v2073_v9  ;;  %v809_v27 = vshll.u32 %v2173_v62, 16  ;;  %vm2263_vm10 = vmand %vm582_vm3, %vm592_vm11 }
  0x25   : > { %v531_v29 = vmax.f32 %v501_v19, 0.0  ;;  %v532_v30 = vmax.f32 %v502_v20, 0.0  ;;  %v797_v31 = vshll.u32 %v2175_v63, 16  ;;  %vm579_vm0 = vcmp.ge.s32.totalorder %v2057_v7, 1  ;;  %vm2273_vm6 = vmand %vm2263_vm10, %vm640_vm9  ;;  %v411_v19 = vld [vmem:[%s2068_s12 + $0x3c] sm:$0xff]  }
  0x26   : > { %1019 = vrot.lane.b32.xlu1 %v2190_v12, %s1961_s29  ;;  %1017 = vrot.lane.b32.xlu0 %v2173_v62, %s1961_s29  ;;  %v731_v10 = vsel %vm2199_vm4, %v530_v25, 0.0  ;;  %v508_v33 = vmul.f32 %v2090_v21, %v471_v26  ;;  %vm781_vm13 = vsmask.f32 7424  ;;  %v807_v36 = vshrl.u32 %v2173_v62, 16 }
  0x27   : > { %v811_v37 = vrot.slane %v809_v27, 1  ;;  %v916_v39 = vsel %vm910_vm1, %v914_v18, %v915_v24  ;;  %v732_v40 = vsel %vm2169_vm7, %v531_v29, 0.0  ;;  %v733_v41 = vsel %vm2210_vm8, %v532_v30, 0.0  ;;  %vm2305_vm8 = vmand %vm2116_vm14, %vm640_vm9 }
  0x28   : > { %v795_v42 = vshrl.u32 %v2175_v63, 16  ;;  %v2267_v43 = vpack.c.bf16 %v732_v40, %v731_v10  ;;  %v762_v44 = vpack.c.bf16 %v733_v41, %v733_v41  ;;  %v538_v45 = vmax.f32 %v508_v33, 0.0 }
  0x29   : > { %v799_v46 = vrot.slane %v797_v31, 1  ;;  %v917_v14 = vrot.slane %v2173_v62, 1  ;;  %v802_v48 = vshll.u32 %v2192_v13, 16  ;;  %v437_v49 = vunpack.c.l.bf16 %v407_v38 }
  0x2a   : > { %vm589_vm7 = vcmp.le.s32.totalorder %v2057_v7, 16  ;;  %1000 = vrot.lane.b32.xlu0 %v916_v39, %s1962_s30  ;;  %v911_v50 = vrot.slane %v2267_v43, 1  ;;  %v912_v51 = vrot.slane %v762_v44, 1  ;;  %v739_v52 = vsel %vm2247_vm12, %v538_v45, 0.0 }
  0x2b   : > { %v2284_v53 = vor.u32 %v811_v37, %v807_v36  ;;  %v766_v54 = vpack.c.bf16 %v739_v52, %v739_v52  ;;  %v783_v55 = vshrl.u32 %v2267_v43, 16  ;;  %v785_v56 = vshll.u32 %v2267_v43, 16  ;;  %vm2318_vm14 = vmand %vm579_vm0, %vm589_vm7  ;;  %v413_v37 = vld [vmem:[%s2068_s12 + $0x44] sm:$0x1] }
  0x2c   : > { %v790_v57 = vshll.u32 %v762_v44, 16  ;;  %v913_v59 = vsel %vm910_vm1, %v911_v50, %v912_v51  ;;  %v800_v60 = vor.u32 %v799_v46, %v795_v42  ;;  %v474_v61 = vsub.f32 %v437_v49, %v2073_v9  ;;  %vm2335_vm11 = vmand %vm2318_vm14, %vm605_vm2 }
  0x2d   : > { %v821_v0 = vshll.u32 %v2190_v12, 16  ;;  %vm580_vm3 = vcmp.ge.s32.totalorder %v2060_v8, 1  ;;  %vm590_vm4 = vcmp.le.s32.totalorder %v2060_v8, 16  ;;  %935 = vrot.lane.b32.xlu1 %v913_v59, %s1963_s7  ;;  %v918_v4 = vrot.slane %v766_v54, 1  ;;  %vm655_vm0 = vmand %vm2318_vm14, %vm640_vm9 }
  0x2e   : > { %v787_v5 = vrot.slane %v785_v56, 1  ;;  %v792_v11 = vrot.slane %v790_v57, 1  ;;  %v814_v13 = vshll.u32 %v766_v54, 16  ;;  %v804_v15 = vrot.slane %v802_v48, 1  ;;  %v1812_v56 = vld [vmem:[%s2068_s12 + $0x48] sm:$0xff]   ;;  %vm2364_vm12 = vmand %vm580_vm3, %vm590_vm4 }
  0x2f   : > { %v511_v16 = vmul.f32 %v2090_v21, %v474_v61  ;;  %v1798_v17 = vunpack.c.l.bf16 %v1811_v58  ;;  %v1799_v18 = vunpack.c.h.bf16 %v1811_v58  ;;  %v2299_v20 = vsel %vm910_vm1, %v917_v14, %v918_v4  ;;  %vm623_vm7 = vmand %vm2364_vm12, %vm605_vm2 }
  0x30   : > { %v788_v23 = vor.u32 %v787_v5, %v783_v55  ;;  %v819_v25 = vshrl.u32 %v2190_v12, 16  ;;  %v440_v26 = vunpack.c.l.bf16 %v410_v2  ;;  %1065 = vrot.lane.b32.xlu0 %v2299_v20, %s1964_s8  ;;  %v823_v29 = vrot.slane %v821_v0, 1  ;;  %vm2415_vm3 = vmand %vm2222_vm15, %vm605_vm2 }
  0x31   : > { %v541_v27 = vmax.f32 %v511_v16, 0.0  ;;  %v475_v30 = vsub.f32 %v1798_v17, %v2073_v9  ;;  %v476_v31 = vsub.f32 %v1799_v18, %v2073_v9  ;;  %937 = vrot.lane.b32.xlu1 %v916_v39, %s1963_s7  ;;  %v816_v33 = vrot.slane %v814_v13, 1  ;;  %vm658_vm4 = vmand %vm2364_vm12, %vm640_vm9 }
  0x32   : > { %v793_v10 = vsel %vm781_vm13, %v788_v23, %v792_v11  ;;  %v477_v34 = vsub.f32 %v440_v26, %v2073_v9  ;;  %v441_v36 = vunpack.c.l.bf16 %v411_v19  ;;  %v442_v41 = vunpack.c.h.bf16 %v411_v19 }
  0x33   : > { %v742_v38 = vsel %vm2305_vm8, %v541_v27, 0.0  ;;  %v512_v40 = vmul.f32 %v2090_v21, %v475_v30  ;;  %v513_v7 = vmul.f32 %v2090_v21, %v476_v31  ;;  %v805_v42 = vsel %vm781_vm13, %v800_v60, %v804_v15  ;;  %v416_v15 = vld [vmem:[%s2068_s12 + $0x50] sm:$0x1]  ;;  %v417_v27 = vld [vmem:[%s2068_s12 + $0x54] sm:$0xff]  }
  0x34   : > { %v768_v44 = vpack.c.bf16 %v742_v38, %v742_v38  ;;  %v514_v45 = vmul.f32 %v2090_v21, %v477_v34  ;;  %v478_v46 = vsub.f32 %v441_v36, %v2073_v9  ;;  %878 = vrot.lane.b32.xlu0 %v793_v10, %s1965_s9  ;;  %v479_v49 = vsub.f32 %v442_v41, %v2073_v9 }
  0x35   : > { %v542_v14 = vmax.f32 %v512_v40, 0.0  ;;  %v543_v48 = vmax.f32 %v513_v7, 0.0  ;;  %v443_v50 = vunpack.c.l.bf16 %v413_v37  ;;  %1002 = vrot.lane.b32.xlu1 %v2299_v20, %s1962_s30  ;;  %v824_v51 = vor.u32 %v823_v29, %v819_v25  ;;  %v422_v40 = vld [vmem:[%s2405_s16 + $0x8] sm:$0x1] }
  0x36   : > { %v826_v52 = vshll.u32 %v768_v44, 16  ;;  %v544_v54 = vmax.f32 %v514_v45, 0.0  ;;  %v515_v55 = vmul.f32 %v2090_v21, %v478_v46  ;;  %v817_v57 = vsel %vm781_vm13, %v2284_v53, %v816_v33  ;;  %v419_v46 = vld [vmem:[%s2068_s12 + $0x5c] sm:$0x1] }
  0x37   : > { %v743_v58 = vsel %vm2335_vm11, %v542_v14, 0.0  ;;  %v744_v59 = vsel %vm2318_vm14, %v543_v48, 0.0  ;;  %v516_v60 = vmul.f32 %v2090_v21, %v479_v49  ;;  %v480_v53 = vsub.f32 %v443_v50, %v2073_v9  ;;  %vm629_vm14 = vmand %vm2263_vm10, %vm605_vm2 }
  0x38   : > { %v828_v61 = vrot.slane %v826_v52, 1  ;;  %v2358_v0 = vpack.c.bf16 %v744_v59, %v743_v58  ;;  %v745_v2 = vsel %vm655_vm0, %v544_v54, 0.0  ;;  %880 = vrot.lane.b32.xlu0 %v805_v42, %s1965_s9  ;;  %v1802_v5 = vunpack.c.l.bf16 %v1812_v56 }
  0x39   : > { %982 = vrot.lane.b32.xlu1 %v817_v57, %s1966_s10  ;;  %v2371_v11 = vpack.c.bf16 %v745_v2, %v745_v2  ;;  %v545_v13 = vmax.f32 %v515_v55, 0.0  ;;  %v546_v17 = vmax.f32 %v516_v60, 0.0  ;;  %v920_v18 = vrot.slane %v2190_v12, 1 }
  0x3a   : > { %v2375_v8 = vsel %vm781_vm13, %v824_v51, %v828_v61  ;;  %v833_v16 = vshll.u32 %v2358_v0, 16  ;;  %v921_v19 = vrot.slane %v768_v44, 1  ;;  %v1803_v23 = vunpack.c.h.bf16 %v1812_v56  ;;  %v1805_v51 = vld [vmem:[%s2405_s16] sm:$0xff]  }
  0x3b   : > { %v517_v24 = vmul.f32 %v2090_v21, %v480_v53  ;;  %v481_v25 = vsub.f32 %v1802_v5, %v2073_v9  ;;  %v446_v26 = vunpack.c.l.bf16 %v416_v15  ;;  %v2389_v29 = vadd.s32 8, %v2040_v1 }
  0x3c   : > { %980 = vrot.lane.b32.xlu0 %v805_v42, %s1966_s10  ;;  %v831_v30 = vshrl.u32 %v2358_v0, 16  ;;  %v838_v31 = vshll.u32 %v2371_v11, 16  ;;  %v746_v35 = vsel %vm623_vm7, %v545_v13, 0.0  ;;  %v2396_v10 = vadd.s32 9, %v2040_v1 }
  0x3d   : > { %1047 = vrot.lane.b32.xlu1 %v2375_v8, %s1967_s13  ;;  %v835_v33 = vrot.slane %v833_v16, 1  ;;  %v747_v34 = vsel %vm2364_vm12, %v546_v17, 0.0  ;;  %v482_v36 = vsub.f32 %v1803_v23, %v2073_v9  ;;  %v518_v37 = vmul.f32 %v2090_v21, %v481_v25 }
  0x3e   : > { %v2408_v38 = vsel %vm910_vm1, %v920_v18, %v921_v19  ;;  %v923_v1 = vrot.slane %v2358_v0, 1  ;;  %v483_v7 = vsub.f32 %v446_v26, %v2073_v9  ;;  %v447_v41 = vunpack.c.l.bf16 %v417_v27 }
  0x3f   : > { %v924_v42 = vrot.slane %v2371_v11, 1  ;;  %v547_v44 = vmax.f32 %v517_v24, 0.0  ;;  %v519_v39 = vmul.f32 %v2090_v21, %v482_v36  ;;  %v548_v45 = vmax.f32 %v518_v37, 0.0 }
  0x40   : > { %1045 = vrot.lane.b32.xlu0 %v817_v57, %s1967_s13  ;;  %v2425_v14 = vpack.c.bf16 %v747_v34, %v746_v35  ;;  %v520_v48 = vmul.f32 %v2090_v21, %v483_v7  ;;  %v448_v49 = vunpack.c.h.bf16 %v417_v27  ;;  %v484_v50 = vsub.f32 %v447_v41, %v2073_v9 }
  0x41   : > { %882 = vrot.lane.b32.xlu1 %v817_v57, %s1965_s9  ;;  %vm583_vm8 = vcmp.ge.s32.totalorder %v2389_v29, 1  ;;  %v836_v52 = vor.u32 %v835_v33, %v831_v30  ;;  %v840_v54 = vrot.slane %v838_v31, 1  ;;  %v549_v55 = vmax.f32 %v519_v39, 0.0 }
  0x42   : > { %v749_v56 = vsel %vm2415_vm3, %v548_v45, 0.0  ;;  %v550_v57 = vmax.f32 %v520_v48, 0.0  ;;  %v485_v58 = vsub.f32 %v448_v49, %v2073_v9  ;;  %v521_v59 = vmul.f32 %v2090_v21, %v484_v50 }
  0x43   : > { %v449_v60 = vunpack.c.l.bf16 %v419_v46  ;;  %v748_v61 = vsel %vm658_vm4, %v547_v44, 0.0  ;;  %v750_v2 = vsel %vm2222_vm15, %v549_v55, 0.0  ;;  %v1806_v4 = vunpack.c.l.bf16 %v1805_v51 }
  0x44   : > { %1067 = vrot.lane.b32.xlu0 %v2408_v38, %s1964_s8  ;;  %v1807_v53 = vunpack.c.h.bf16 %v1805_v51  ;;  %v2445_v5 = vpack.c.bf16 %v750_v2, %v749_v56  ;;  %v751_v11 = vsel %vm2232_vm5, %v550_v57, 0.0  ;;  %v522_v13 = vmul.f32 %v2090_v21, %v485_v58 }
  0x45   : > { %884 = vrot.lane.b32.xlu1 %v2375_v8, %s1965_s9  ;;  %v551_v15 = vmax.f32 %v521_v59, 0.0  ;;  %v2454_v28 = vpack.c.bf16 %v751_v11, %v751_v11  ;;  %v486_v16 = vsub.f32 %v449_v60, %v2073_v9  ;;  %v487_v17 = vsub.f32 %v1806_v4, %v2073_v9 }
  0x46   : > { %v488_v18 = vsub.f32 %v1807_v53, %v2073_v9  ;;  %v2460_v19 = vsel %vm910_vm1, %v923_v1, %v924_v42  ;;  %v845_v32 = vshll.u32 %v2425_v14, 16  ;;  %v929_v23 = vrot.slane %v2445_v5, 1  ;;  %v425_v53 = vld [vmem:[%s2405_s16 + $0x14] sm:$0x1] }
  0x47   : > { %v552_v24 = vmax.f32 %v522_v13, 0.0  ;;  %v2466_v25 = vpack.c.bf16 %v748_v61, %v748_v61  ;;  %v930_v26 = vrot.slane %v2454_v28, 1  ;;  %v752_v27 = vsel %vm629_vm14, %v551_v15, 0.0 }
  0x48   : > { %939 = vrot.lane.b32.xlu0 %v2299_v20, %s1963_s7  ;;  %v523_v30 = vmul.f32 %v2090_v21, %v486_v16  ;;  %v843_v31 = vshrl.u32 %v2425_v14, 16  ;;  %v524_v33 = vmul.f32 %v2090_v21, %v487_v17  ;;  %v525_v20 = vmul.f32 %v2090_v21, %v488_v18 }
  0x49   : > { %941 = vrot.lane.b32.xlu1 %v2408_v38, %s1963_s7  ;;  %v753_v35 = vsel %vm2263_vm10, %v552_v24, 0.0  ;;  %v2478_v34 = vsel %vm781_vm13, %v836_v52, %v840_v54  ;;  %v2481_v36 = vsel %vm910_vm1, %v929_v23, %v930_v26  ;;  %v847_v7 = vrot.slane %v845_v32, 1 }
  0x4a   : > { %v2483_v37 = vpack.c.bf16 %v753_v35, %v752_v27  ;;  %v553_v1 = vmax.f32 %v523_v30, 0.0  ;;  %v554_v41 = vmax.f32 %v524_v33, 0.0  ;;  %v555_v42 = vmax.f32 %v525_v20, 0.0  ;;  %v1916_v27 = vld [vmem:[%s2830_s4 + $0x18] sm:$0xff]  }
  0x4b   : > { %vm593_vm15 = vcmp.le.s32.totalorder %v2389_v29, 16  ;;  %v850_v44 = vshll.u32 %v2466_v25, 16  ;;  %v452_v47 = vunpack.c.l.bf16 %v422_v40  ;;  %v453_v29 = vunpack.c.l.bf16 %v423_v22 }
  0x4c   : > { %956 = vrot.lane.b32.xlu0 %v2190_v12, %s1960_s20  ;;  %v754_v39 = vsel %vm2273_vm6, %v553_v1, 0.0  ;;  %v867_v45 = vshrl.u32 %v2483_v37, 16  ;;  %v869_v46 = vshll.u32 %v2483_v37, 16  ;;  %vm603_vm5 = vmand %vm583_vm8, %vm593_vm15  ;;  %v932_v49 = vrot.slane %v2483_v37, 1 }
  0x4d   : > { %958 = vrot.lane.b32.xlu1 %v2358_v0, %s1960_s20  ;;  %v776_v48 = vpack.c.bf16 %v754_v39, %v754_v39  ;;  %vm632_vm10 = vmand %vm603_vm5, %vm605_vm2  ;;  %v756_v50 = vsel %vm603_vm5, %v555_v42, 0.0  ;;  %v454_v55 = vunpack.c.h.bf16 %v423_v22  ;;  %v489_v59 = vsub.f32 %v452_v47, %v2073_v9 }
  0x4e   : > { %v871_v51 = vrot.slane %v869_v46, 1  ;;  %v755_v52 = vsel %vm632_vm10, %v554_v41, 0.0  ;;  %vm2504_vm6 = vmand %vm603_vm5, %vm640_vm9  ;;  %v848_v60 = vor.u32 %v847_v7, %v843_v31  ;;  %v490_v2 = vsub.f32 %v453_v29, %v2073_v9 }
  0x4f   : > { %v874_v56 = vshll.u32 %v776_v48, 16  ;;  %v933_v57 = vrot.slane %v776_v48, 1  ;;  %v2508_v58 = vpack.c.bf16 %v756_v50, %v755_v52  ;;  %v491_v4 = vsub.f32 %v454_v55, %v2073_v9  ;;  %v1918_v52 = vld [vmem:[%s2830_s4 + $0x8] sm:$0xff]  }
  0x50   : > { %984 = vrot.lane.b32.xlu0 %v2375_v8, %s1966_s10  ;;  %v872_v61 = vor.u32 %v871_v51, %v867_v45  ;;  %v526_v15 = vmul.f32 %v2090_v21, %v489_v59  ;;  %vm584_vm11 = vcmp.ge.s32.totalorder %v2396_v10, 1  ;;  %v1915_v8 = vld [vmem:[%s2830_s4 + $0x20] ss:$0 sps:$4 sm:$0xff]   ;;  %v527_v18 = vmul.f32 %v2090_v21, %v490_v2 }
  0x51   : > { %986 = vrot.lane.b32.xlu1 %v2478_v34, %s1966_s10  ;;  %v876_v11 = vrot.slane %v874_v56, 1  ;;  %v2519_v13 = vsel %vm910_vm1, %v932_v49, %v933_v57  ;;  %v969_v16 = vshrl.u32 %v2508_v58, 16  ;;  %v971_v17 = vshll.u32 %v2508_v58, 16  ;;  %v1919_v2 = vld [vmem:[%s2830_s4] sm:$0xff]  }
  0x52   : > { %v528_v32 = vmul.f32 %v2090_v21, %v491_v4  ;;  %v556_v24 = vmax.f32 %v526_v15, 0.0  ;;  %vm594_vm0 = vcmp.le.s32.totalorder %v2396_v10, 16  ;;  %v455_v26 = vunpack.c.l.bf16 %v425_v53 }
  0x53   : > { %v2531_v23 = vsel %vm781_vm13, %v872_v61, %v876_v11  ;;  %v973_v30 = vrot.slane %v971_v17, 1  ;;  %v557_v31 = vmax.f32 %v527_v18, 0.0  ;;  %vm604_vm12 = vmand %vm584_vm11, %vm594_vm0  ;;  %vm1270_vm7 = vcmask 1043456  }
  0x54   : > { %1004 = vrot.lane.b32.xlu0 %v2408_v38, %s1962_s30  ;;  %v558_v35 = vmax.f32 %v528_v32, 0.0  ;;  %v852_v33 = vrot.slane %v850_v44, 1  ;;  %v757_v20 = vsel %vm2504_vm6, %v556_v24, 0.0  ;;  %vm635_vm3 = vmand %vm604_vm12, %vm605_vm2  ;;  %v492_v1 = vsub.f32 %v455_v26, %v2073_v9  ;;  %1862 = vmatprep.subr.msk.bf16.mxu0 %vm1270_vm7, %v1915_v8  ;;  %v1917_v9 = vld [vmem:[%s2830_s4 + $0x10] sm:$0xff]  }
  0x55   : > { %1006 = vrot.lane.b32.xlu1 %v2460_v19, %s1962_s30  ;;  %v1272_v38 = vsel %vm1270_vm7, %v1915_v8, 0  ;;  %v778_v40 = vpack.c.bf16 %v757_v20, %v757_v20  ;;  %v997_v7 = vrot.slane %v2508_v58, 1  ;;  %v758_v10 = vsel %vm635_vm3, %v557_v31, 0.0  ;;  %vm2551_vm4 = vmand %vm604_vm12, %vm640_vm9  ;;  %1863 = vmatprep.subr.msk.bf16.mxu1 %vm1270_vm7, %v1915_v8 }
  0x56   : > { %v759_v41 = vsel %vm604_vm12, %v558_v35, 0.0  ;;  %1827 = vmatpush3.bf16.msra.mxu0 %v1272_v38  ;;  %v529_v3 = vmul.f32 %v2090_v21, %v492_v1  ;;  %1857 = vmatpush3.bf16.msra.mxu1 %v1272_v38  ;;  %v974_v6 = vor.u32 %v973_v30, %v969_v16  ;;  %v853_v21 = vsel %vm781_vm13, %v848_v60, %v852_v33 }
  0x57   : > { %v2555_v22 = vpack.c.bf16 %v759_v41, %v758_v10  ;;  %1828 = vmatprep.subr.bf16.mxu0 %v1916_v27  ;;  %v976_v44 = vshll.u32 %v778_v40, 16  ;;  %v998_v39 = vrot.slane %v778_v40, 1  ;;  %1853 = vmatprep.subr.bf16.mxu1 %v1916_v27  ;;  %v926_v56 = vrot.slane %v2425_v14, 1 }
  0x58   : > { %1021 = vrot.lane.b32.xlu0 %v2358_v0, %s1961_s29  ;;  %v559_v45 = vmax.f32 %v529_v3, 0.0  ;;  %v927_v57 = vrot.slane %v2466_v25, 1  ;;  %v857_v11 = vshll.u32 %v2445_v5, 16  ;;  %v855_v8 = vshrl.u32 %v2445_v5, 16 }
  0x59   : > { %1023 = vrot.lane.b32.xlu1 %v2425_v14, %s1961_s29  ;;  %v1036_v46 = vshll.u32 %v2555_v22, 16  ;;  %v978_v48 = vrot.slane %v976_v44, 1  ;;  %v2568_v49 = vsel %vm910_vm1, %v997_v7, %v998_v39  ;;  %v1034_v50 = vshrl.u32 %v2555_v22, 16 }
  0x5a   : > { %1829 = vmatpush3.bf16.msra.mxu0 %v1916_v27  ;;  %v760_v47 = vsel %vm2551_vm4, %v559_v45, 0.0  ;;  %1858 = vmatpush3.bf16.msra.mxu1 %v1916_v27  ;;  %v1062_v55 = vrot.slane %v2555_v22, 1  ;;  %v928_v25 = vsel %vm910_vm1, %v926_v56, %v927_v57  ;;  %v859_v16 = vrot.slane %v857_v11, 1 }
  0x5b   : > { %v1038_v51 = vrot.slane %v1036_v46, 1  ;;  %1830 = vmatprep.subr.bf16.mxu0 %v1917_v9  ;;  %v2579_v54 = vsel %vm781_vm13, %v974_v6, %v978_v48  ;;  %v780_v29 = vpack.c.bf16 %v760_v47, %v760_v47  ;;  %1854 = vmatprep.subr.bf16.mxu1 %v1917_v9  ;;  %v862_v17 = vshll.u32 %v2454_v28, 16 }
  0x5c   : > { %1049 = vrot.lane.b32.xlu0 %v2478_v34, %s1967_s13  ;;  %vm1081_vm2 = vcmask 64512   ;;  %vm1098_vm9 = vcmask 130048   ;;  %vm1149_vm8 = vcmask 326656   ;;  %vm1166_vm14 = vcmask 392192  }
  0x5d   : > { %1051 = vrot.lane.b32.xlu1 %v853_v21, %s1967_s13  ;;  %v1039_v59 = vor.u32 %v1038_v51, %v1034_v50  ;;  %v1041_v60 = vshll.u32 %v780_v29, 16  ;;  %v1063_v61 = vrot.slane %v780_v29, 1  ;;  %v864_v18 = vrot.slane %v862_v17, 1 }
  0x5e   : > { %1831 = vmatpush3.bf16.msra.mxu0 %v1917_v9  ;;  %1859 = vmatpush3.bf16.msra.mxu1 %v1917_v9  ;;  %vm1200_vm15 = vcmask 523264   ;;  %vm1183_vm5 = vcmask 457728   ;;  %vm1253_vm10 = vcmask 588800   ;;  %vm1435_vm6 = vcmask 60416  }
  0x5f   : > { %1832 = vmatprep.subr.bf16.mxu0 %v1918_v52  ;;  %v1043_v4 = vrot.slane %v1041_v60, 1  ;;  %v1064_v53 = vsel %vm910_vm1, %v1062_v55, %v1063_v61  ;;  %1855 = vmatprep.subr.bf16.mxu1 %v1918_v52  ;;  %vm1115_vm1 = vcmask 195584   ;;  %vm1542_vm11 = vcmask 1040384  }
  0x60   : > { %1069 = vrot.lane.b32.xlu0 %v2460_v19, %s1964_s8  ;;  %vm1544_vm0 = vcmask 58368  }
  0x61   : > { %886 = vrot.lane.b32.xlu1 %v2478_v34, %s1965_s9  ;;  %v1044_v15 = vsel %vm781_vm13, %v1039_v59, %v1043_v4  ;;  %v860_v34 = vor.u32 %v859_v16, %v855_v8 }
  0x62   : > { %1833 = vmatpush3.bf16.msra.mxu0 %v1918_v52  ;;  %1860 = vmatpush3.bf16.msra.mxu1 %v1918_v52 }
  0x63   : > { %1834 = vmatprep.subr.bf16.mxu0 %v1919_v2  ;;  %1856 = vmatprep.subr.bf16.mxu1 %v1919_v2  ;;  %v865_v32 = vsel %vm781_vm13, %v860_v34, %v864_v18  ;;  %vm1132_vm13 = vcmask 261120  }
  0x64   : > { %1071 = vrot.lane.b32.xlu0 %v928_v25, %s1964_s8 }
  0x65   : > { %888 = vrot.lane.b32.xlu1 %v853_v21, %s1965_s9 }
  0x66   : > { %1835 = vmatpush3.bf16.msra.mxu0 %v1919_v2  ;;  %1861 = vmatpush3.bf16.msra.mxu1 %v1919_v2 }
  0x68   : > { %943 = vrot.lane.b32.xlu0 %v2460_v19, %s1963_s7 }
  0x69   : > { %945 = vrot.lane.b32.xlu1 %v928_v25, %s1963_s7 }
  0x6c   : > { %960 = vrot.lane.b32.xlu0 %v2425_v14, %s1960_s20 }
  0x6d   : > { %962 = vrot.lane.b32.xlu1 %v2445_v5, %s1960_s20 }
  0x70   : > { %988 = vrot.lane.b32.xlu0 %v853_v21, %s1966_s10 }
  0x71   : > { %990 = vrot.lane.b32.xlu1 %v865_v32, %s1966_s10 }
  0x74   : > { %1008 = vrot.lane.b32.xlu0 %v928_v25, %s1962_s30 }
  0x75   : > { %1010 = vrot.lane.b32.xlu1 %v2481_v36, %s1962_s30 }
  0x78   : > { %1025 = vrot.lane.b32.xlu0 %v2445_v5, %s1961_s29 }
  0x79   : > { %1027 = vrot.lane.b32.xlu1 %v2483_v37, %s1961_s29 }
  0x7c   : > { %1053 = vrot.lane.b32.xlu0 %v865_v32, %s1967_s13 }
  0x7d   : > { %1055 = vrot.lane.b32.xlu1 %v2531_v23, %s1967_s13 }
  0x80   : > { %1073 = vrot.lane.b32.xlu0 %v2481_v36, %s1964_s8 }
  0x81   : > { %890 = vrot.lane.b32.xlu1 %v865_v32, %s1965_s9 }
  0x84   : > { %1075 = vrot.lane.b32.xlu0 %v2519_v13, %s1964_s8 }
  0x85   : > { %892 = vrot.lane.b32.xlu1 %v2531_v23, %s1965_s9 }
  0x88   : > { %947 = vrot.lane.b32.xlu0 %v2481_v36, %s1963_s7 }
  0x89   : > { %949 = vrot.lane.b32.xlu1 %v2519_v13, %s1963_s7 }
  0x8c   : > { %964 = vrot.lane.b32.xlu0 %v2483_v37, %s1960_s20 }
  0x8d   : > { %966 = vrot.lane.b32.xlu1 %v2508_v58, %s1960_s20  ;;  %s1726_s20 = sshll.u32 %s2888_s28, 1  ;;  %s1729_s28 = sshll.u32 %s2884_s22, 1 }
  0x90   : > { %992 = vrot.lane.b32.xlu0 %v2531_v23, %s1966_s10 }
  0x91   : > { %994 = vrot.lane.b32.xlu1 %v2579_v54, %s1966_s10 }
  0x94   : > { %1012 = vrot.lane.b32.xlu0 %v2519_v13, %s1962_s30  ;;  %v955_v28 = vpop.permute.xlu1 %954  ;;  %v953_v19 = vpop.permute.xlu0 %952 }
  0x95   : > { %1014 = vrot.lane.b32.xlu1 %v2568_v49, %s1962_s30 }
  0x98   : > { %1029 = vrot.lane.b32.xlu0 %v2508_v58, %s1961_s29  ;;  %v1018_v36 = vpop.permute.xlu0 %1017  ;;  %v1020_v24 = vpop.permute.xlu1 %1019 }
  0x99   : > { %1031 = vrot.lane.b32.xlu1 %v2555_v22, %s1961_s29  ;;  %s1727_s29 = sshll.u32 %s2884_s22, 5 }
  0x9a   : > { %s383_s30 = sadd.s32 %s1727_s29, %s1726_s20 }
  0x9b   : > { %s1728_s7 = sshll.u32 %s383_s30, 2 }
  0x9c   : > { %1057 = vrot.lane.b32.xlu0 %v2579_v54, %s1967_s13  ;;  %v1001_v23 = vpop.permute.xlu0 %1000  ;;  %s2739_s10 = scalar_lea.vmem %s2831_s5, %s1728_s7 }
  0x9d   : > { %1059 = vrot.lane.b32.xlu1 %v1044_v15, %s1967_s13  ;;  %s392_s13 = sadd.s32 %s1729_s28, %s2890_s21 }
  0x9e   : > { %s1730_s18 = sshll.u32 %s392_s13, 1 }
  0x9f   : > { %v936_v13 = vpop.permute.xlu1 %935  ;;  %s394_s14 = scalar_lea.vmem %s2832_s6, %s1730_s18 }
  0xa0   : > { %1077 = vrot.lane.b32.xlu0 %v2568_v49, %s1964_s8 }
  0xa1   : > { %1079 = vrot.lane.b32.xlu1 %v1064_v53, %s1964_s8 }
  0xa2   : > { %v1066_v26 = vpop.permute.xlu0 %1065 }
  0xa3   : > { %v938_v27 = vpop.permute.xlu1 %937 }
  0xa6   : > { %v879_v58 = vpop.permute.xlu0 %878 }
  0xa7   : > { %v1003_v30 = vpop.permute.xlu1 %1002  ;;  %v1083_v31 = vsel %vm1081_vm2, %v2267_v43, %v879_v58 }
  0xa8   : > { %v1100_v33 = vsel %vm1098_vm9, %v1083_v31, %v936_v13 }
  0xa9   : > { %v1117_v10 = vsel %vm1115_vm1, %v1100_v33, %v953_v19 }
  0xaa   : > { %v881_v35 = vpop.permute.xlu0 %880 }
  0xab   : > { %v983_v20 = vpop.permute.xlu1 %982  ;;  %v1085_v1 = vsel %vm1081_vm2, %v2175_v63, %v881_v35 }
  0xac   : > { %v1102_v38 = vsel %vm1098_vm9, %v1085_v1, %v938_v27 }
  0xad   : > { %v1119_v40 = vsel %vm1115_vm1, %v1102_v38, %v955_v28 }
  0xae   : > { %v1136_v7 = vsel %vm1132_vm13, %v1119_v40, %v983_v20  ;;  %v981_v43 = vpop.permute.xlu0 %980 }
  0xaf   : > { %v1048_v41 = vpop.permute.xlu1 %1047  ;;  %v1134_v42 = vsel %vm1132_vm13, %v1117_v10, %v981_v43  ;;  %v1153_v22 = vsel %vm1149_vm8, %v1136_v7, %v1003_v30 }
  0xb0   : > { %v1151_v3 = vsel %vm1149_vm8, %v1134_v42, %v1001_v23  ;;  %v1170_v6 = vsel %vm1166_vm14, %v1153_v22, %v1020_v24 }
  0xb1   : > { %v1168_v63 = vsel %vm1166_vm14, %v1151_v3, %v1018_v36  ;;  %v1187_v46 = vsel %vm1183_vm5, %v1170_v6, %v1048_v41 }
  0xb2   : > { %v1046_v9 = vpop.permute.xlu0 %1045 }
  0xb3   : > { %v883_v44 = vpop.permute.xlu1 %882  ;;  %v1185_v39 = vsel %vm1183_vm5, %v1168_v63, %v1046_v9 }
  0xb4   : > { %v1202_v45 = vsel %vm1200_vm15, %v1185_v39, %v1066_v26  ;;  %v1087_v60 = vsel %vm1081_vm2, %v2173_v62, %v883_v44 }
  0xb5   : > { %1836 = vmatprep.mubr.msk.bf16.mxu0 %vm1253_vm10, %v1202_v45 }
  0xb6   : > { %v1068_v21 = vpop.permute.xlu0 %1067 }
  0xb7   : > { %v885_v48 = vpop.permute.xlu1 %884  ;;  %v1204_v49 = vsel %vm1200_vm15, %v1187_v46, %v1068_v21 }
  0xb8   : > { %1837 = vmatmul.mubr.msk.bf16.vlgmr.msra.gmra.mxu0 %vm1253_vm10, %v1204_v49  ;;  %v1089_v11 = vsel %vm1081_vm2, %v2190_v12, %v885_v48 }
  0xba   : > { %v940_v50 = vpop.permute.xlu0 %939 }
  0xbb   : > { %v942_v47 = vpop.permute.xlu1 %941  ;;  %v1104_v61 = vsel %vm1098_vm9, %v1087_v60, %v940_v50 }
  0xbc   : > { %v1106_v8 = vsel %vm1098_vm9, %v1089_v11, %v942_v47 }
  0xbe   : > { %v957_v51 = vpop.permute.xlu0 %956 }
  0xbf   : > { %v959_v52 = vpop.permute.xlu1 %958  ;;  %v1121_v2 = vsel %vm1115_vm1, %v1104_v61, %v957_v51 }
  0xc0   : > { %v1123_v17 = vsel %vm1115_vm1, %v1106_v8, %v959_v52 }
  0xc2   : > { %v985_v54 = vpop.permute.xlu0 %984 }
  0xc3   : > { %v987_v29 = vpop.permute.xlu1 %986  ;;  %v1138_v53 = vsel %vm1132_vm13, %v1121_v2, %v985_v54 }
  0xc4   : > { %v1140_v18 = vsel %vm1132_vm13, %v1123_v17, %v987_v29 }
  0xc6   : > { %v1005_v55 = vpop.permute.xlu0 %1004 }
  0xc7   : > { %v1007_v56 = vpop.permute.xlu1 %1006  ;;  %v1155_v15 = vsel %vm1149_vm8, %v1138_v53, %v1005_v55 }
  0xc8   : > { %v1157_v19 = vsel %vm1149_vm8, %v1140_v18, %v1007_v56 }
  0xca   : > { %v1022_v57 = vpop.permute.xlu0 %1021 }
  0xcb   : > { %v1024_v59 = vpop.permute.xlu1 %1023  ;;  %v1172_v16 = vsel %vm1166_vm14, %v1155_v15, %v1022_v57 }
  0xcc   : > { %v1174_v12 = vsel %vm1166_vm14, %v1157_v19, %v1024_v59 }
  0xce   : > { %v1050_v4 = vpop.permute.xlu0 %1049 }
  0xcf   : > { %v1052_v25 = vpop.permute.xlu1 %1051  ;;  %v1189_v62 = vsel %vm1183_vm5, %v1172_v16, %v1050_v4 }
  0xd0   : > { %v1191_v36 = vsel %vm1183_vm5, %v1174_v12, %v1052_v25 }
  0xd2   : > { %v1070_v34 = vpop.permute.xlu0 %1069 }
  0xd3   : > { %v887_v32 = vpop.permute.xlu1 %886  ;;  %v1206_v28 = vsel %vm1200_vm15, %v1189_v62, %v1070_v34 }
  0xd4   : > { %1840 = vmatprep.mubr.msk.bf16.mxu0 %vm1253_vm10, %v1206_v28  ;;  %v1091_v40 = vsel %vm1081_vm2, %v2358_v0, %v887_v32 }
  0xd6   : > { %v1072_v24 = vpop.permute.xlu0 %1071 }
  0xd7   : > { %v889_v23 = vpop.permute.xlu1 %888  ;;  %v1208_v13 = vsel %vm1200_vm15, %v1191_v36, %v1072_v24 }
  0xd8   : > { %1841 = vmatmul.mubr.msk.bf16.gmra.mxu0 %vm1253_vm10, %v1208_v13  ;;  %v1093_v22 = vsel %vm1081_vm2, %v2425_v14, %v889_v23 }
  0xda   : > { %v944_v26 = vpop.permute.xlu0 %943 }
  0xdb   : > { %v946_v27 = vpop.permute.xlu1 %945  ;;  %v1108_v7 = vsel %vm1098_vm9, %v1091_v40, %v944_v26 }
  0xdc   : > { %v1110_v63 = vsel %vm1098_vm9, %v1093_v22, %v946_v27 }
  0xde   : > { %v961_v58 = vpop.permute.xlu0 %960 }
  0xdf   : > { %v963_v30 = vpop.permute.xlu1 %962  ;;  %v1125_v10 = vsel %vm1115_vm1, %v1108_v7, %v961_v58 }
  0xe0   : > { %v1127_v6 = vsel %vm1115_vm1, %v1110_v63, %v963_v30 }
  0xe2   : > { %v989_v31 = vpop.permute.xlu0 %988 }
  0xe3   : > { %v991_v35 = vpop.permute.xlu1 %990  ;;  %v1142_v41 = vsel %vm1132_vm13, %v1125_v10, %v989_v31 }
  0xe4   : > { %v1144_v39 = vsel %vm1132_vm13, %v1127_v6, %v991_v35 }
  0xe6   : > { %v1009_v33 = vpop.permute.xlu0 %1008 }
  0xe7   : > { %v1011_v20 = vpop.permute.xlu1 %1010  ;;  %v1159_v3 = vsel %vm1149_vm8, %v1142_v41, %v1009_v33 }
  0xe8   : > { %v1161_v21 = vsel %vm1149_vm8, %v1144_v39, %v1011_v20 }
  0xea   : > { %v1026_v1 = vpop.permute.xlu0 %1025 }
  0xeb   : > { %v1028_v38 = vpop.permute.xlu1 %1027  ;;  %v1176_v9 = vsel %vm1166_vm14, %v1159_v3, %v1026_v1 }
  0xec   : > { %v1178_v14 = vsel %vm1166_vm14, %v1161_v21, %v1028_v38 }
  0xee   : > { %v1054_v43 = vpop.permute.xlu0 %1053 }
  0xef   : > { %v1056_v42 = vpop.permute.xlu1 %1055  ;;  %v1193_v0 = vsel %vm1183_vm5, %v1176_v9, %v1054_v43 }
  0xf0   : > { %v1195_v48 = vsel %vm1183_vm5, %v1178_v14, %v1056_v42 }
  0xf2   : > { %v1074_v44 = vpop.permute.xlu0 %1073 }
  0xf3   : > { %v891_v45 = vpop.permute.xlu1 %890  ;;  %v1210_v46 = vsel %vm1200_vm15, %v1193_v0, %v1074_v44 }
  0xf4   : > { %1844 = vmatprep.mubr.msk.bf16.mxu1 %vm1253_vm10, %v1210_v46  ;;  %v1095_v2 = vsel %vm1081_vm2, %v2445_v5, %v891_v45 }
  0xf6   : > { %v1076_v49 = vpop.permute.xlu0 %1075 }
  0xf7   : > { %v893_v50 = vpop.permute.xlu1 %892  ;;  %v1212_v47 = vsel %vm1200_vm15, %v1195_v48, %v1076_v49 }
  0xf8   : > { %1845 = vmatmul.mubr.msk.bf16.vlgmr.msra.gmra.mxu1 %vm1253_vm10, %v1212_v47  ;;  %v1097_v4 = vsel %vm1081_vm2, %v2483_v37, %v893_v50 }
  0xfa   : > { %v948_v51 = vpop.permute.xlu0 %947 }
  0xfb   : > { %v950_v52 = vpop.permute.xlu1 %949  ;;  %v1112_v53 = vsel %vm1098_vm9, %v1095_v2, %v948_v51 }
  0xfc   : > { %v1114_v25 = vsel %vm1098_vm9, %v1097_v4, %v950_v52 }
  0xfe   : > { %v965_v54 = vpop.permute.xlu0 %964 }
  0xff   : > { %v967_v29 = vpop.permute.xlu1 %966  ;;  %v1129_v11 = vsel %vm1115_vm1, %v1112_v53, %v965_v54 }
 0x100   : > { %v1131_v8 = vsel %vm1115_vm1, %v1114_v25, %v967_v29 }
 0x102   : > { %v993_v55 = vpop.permute.xlu0 %992 }
 0x103   : > { %v995_v56 = vpop.permute.xlu1 %994  ;;  %v1146_v16 = vsel %vm1132_vm13, %v1129_v11, %v993_v55 }
 0x104   : > { %v1148_v62 = vsel %vm1132_vm13, %v1131_v8, %v995_v56 }
 0x106   : > { %v1013_v57 = vpop.permute.xlu0 %1012 }
 0x107   : > { %v1015_v59 = vpop.permute.xlu1 %1014  ;;  %v1163_v5 = vsel %vm1149_vm8, %v1146_v16, %v1013_v57 }
 0x108   : > { %v1165_v37 = vsel %vm1149_vm8, %v1148_v62, %v1015_v59 }
 0x10a   : > { %v1030_v60 = vpop.permute.xlu0 %1029 }
 0x10b   : > { %v1032_v61 = vpop.permute.xlu1 %1031  ;;  %v1180_v34 = vsel %vm1166_vm14, %v1163_v5, %v1030_v60 }
 0x10c   : > { %v1182_v18 = vsel %vm1166_vm14, %v1165_v37, %v1032_v61 }
 0x10e   : > { %v1058_v15 = vpop.permute.xlu0 %1057 }
 0x10f   : > { %v1060_v17 = vpop.permute.xlu1 %1059  ;;  %v1197_v32 = vsel %vm1183_vm5, %v1180_v34, %v1058_v15 }
 0x110   : > { %v1199_v19 = vsel %vm1183_vm5, %v1182_v18, %v1060_v17 }
 0x112   : > { %v1078_v28 = vpop.permute.xlu0 %1077 }
 0x113   : > { %v1080_v12 = vpop.permute.xlu1 %1079  ;;  %v1214_v36 = vsel %vm1200_vm15, %v1197_v32, %v1078_v28 }
 0x114   : > { %v1216_v24 = vsel %vm1200_vm15, %v1199_v19, %v1080_v12  ;;  %1848 = vmatprep.mubr.msk.bf16.mxu1 %vm1253_vm10, %v1214_v36 }
 0x115   : > { %1849 = vmatmul.mubr.msk.bf16.gmra.mxu1 %vm1253_vm10, %v1216_v24 }
 0x178   : > { %v1838_v23 = vpop.f32.mrf.mxu0 }
 0x179   : > { %v1774_v13 = vpack.c.bf16 %v1838_v23, %v1838_v23  ;;  %v1491_v35 = vmul.f32 %v1838_v23, %v1838_v23  ;;  %v1455_v10 = vsel %vm1081_vm2, %v1838_v23, 0.0 }
 0x17a   : > { %v1308_v26 = vpop.f32.mrf.mxu0 }
 0x17b   : > { %1438 = vst.msk [vmem:[%s2739_s10 + $0x8] sm:$0xf] %vm1435_vm6, %v1774_v13  ;;  %v1772_v27 = vpack.c.bf16 %v1308_v26, %v1308_v26  ;;  %v1489_v30 = vmul.f32 %v1308_v26, %v1308_v26  ;;  %v1452_v20 = vsel %vm1081_vm2, %v1308_v26, 0.0  ;;  %v1508_v63 = vsel %vm1081_vm2, %v1491_v35, 0.0 }
 0x17c   : > { %v1839_v58 = vpop.f32.mrf.mxu0 }
 0x17d   : > { %1436 = vst.msk [vmem:[%s2739_s10] sm:$0xf] %vm1435_vm6, %v1772_v27  ;;  %v1775_v31 = vpack.c.bf16 %v1839_v58, %v1839_v58  ;;  %v1505_v43 = vsel %vm1081_vm2, %v1489_v30, 0.0  ;;  %v1492_v41 = vmul.f32 %v1839_v58, %v1839_v58  ;;  %v1457_v9 = vsel %vm1081_vm2, %v1839_v58, 0.0 }
 0x17e   : > { %v1311_v33 = vpop.f32.mrf.mxu0 }
 0x17f   : > { %1439 = vst.msk [vmem:[%s2739_s10 + $0xc] sm:$0xf] %vm1435_vm6, %v1775_v31  ;;  %v1773_v1 = vpack.c.bf16 %v1311_v33, %v1311_v33  ;;  %v1453_v38 = vsel %vm1081_vm2, %v1311_v33, 0.0  ;;  %v1490_v40 = vmul.f32 %v1311_v33, %v1311_v33  ;;  %v1510_v44 = vsel %vm1081_vm2, %v1492_v41, 0.0 }
 0x180   : > { %v1454_v7 = vadd.f32 %v1453_v38, %v1452_v20 }
 0x181   : > { %1437 = vst.msk [vmem:[%s2739_s10 + $0x4] sm:$0xf] %vm1435_vm6, %v1773_v1  ;;  %v1506_v42 = vsel %vm1081_vm2, %v1490_v40, 0.0 }
 0x182   : > { %v1456_v22 = vadd.f32 %v1455_v10, %v1454_v7  ;;  %v1507_v3 = vadd.f32 %v1506_v42, %v1505_v43 }
 0x184   : > { %v1509_v6 = vadd.f32 %v1508_v63, %v1507_v3  ;;  %v1458_v0 = vadd.f32 %v1457_v9, %v1456_v22 }
 0x186   : > { %v1511_v39 = vadd.f32 %v1510_v44, %v1509_v6 }
 0x198   : > { %v1842_v45 = vpop.f32.mrf.mxu0 }
 0x199   : > { %v1778_v46 = vpack.c.bf16 %v1842_v45, %v1842_v45  ;;  %v1495_v16 = vmul.f32 %v1842_v45, %v1842_v45  ;;  %v1463_v62 = vsel %vm1081_vm2, %v1842_v45, 0.0 }
 0x19a   : > { %v1324_v21 = vpop.f32.mrf.mxu0 }
 0x19b   : > { %1442 = vst.msk [vmem:[%s2739_s10 + $0x18] sm:$0xf] %vm1435_vm6, %v1778_v46  ;;  %v1776_v14 = vpack.c.bf16 %v1324_v21, %v1324_v21  ;;  %v1493_v57 = vmul.f32 %v1324_v21, %v1324_v21  ;;  %v1459_v61 = vsel %vm1081_vm2, %v1324_v21, 0.0  ;;  %v1516_v37 = vsel %vm1081_vm2, %v1495_v16, 0.0 }
 0x19c   : > { %v1843_v48 = vpop.f32.mrf.mxu0  ;;  %v1460_v25 = vadd.f32 %v1459_v61, %v1458_v0 }
 0x19d   : > { %1440 = vst.msk [vmem:[%s2739_s10 + $0x10] sm:$0xf] %vm1435_vm6, %v1776_v14  ;;  %v1779_v49 = vpack.c.bf16 %v1843_v48, %v1843_v48  ;;  %v1512_v4 = vsel %vm1081_vm2, %v1493_v57, 0.0  ;;  %v1496_v34 = vmul.f32 %v1843_v48, %v1843_v48  ;;  %v1465_v28 = vsel %vm1081_vm2, %v1843_v48, 0.0 }
 0x19e   : > { %v1327_v50 = vpop.f32.mrf.mxu0  ;;  %v1513_v15 = vadd.f32 %v1512_v4, %v1511_v39 }
 0x19f   : > { %1443 = vst.msk [vmem:[%s2739_s10 + $0x1c] sm:$0xf] %vm1435_vm6, %v1779_v49  ;;  %v1777_v47 = vpack.c.bf16 %v1327_v50, %v1327_v50  ;;  %v1494_v2 = vmul.f32 %v1327_v50, %v1327_v50  ;;  %v1461_v53 = vsel %vm1081_vm2, %v1327_v50, 0.0  ;;  %v1518_v24 = vsel %vm1081_vm2, %v1496_v34, 0.0 }
 0x1a0   : > { %v1462_v8 = vadd.f32 %v1461_v53, %v1460_v25 }
 0x1a1   : > { %1441 = vst.msk [vmem:[%s2739_s10 + $0x14] sm:$0xf] %vm1435_vm6, %v1777_v47  ;;  %v1514_v11 = vsel %vm1081_vm2, %v1494_v2, 0.0 }
 0x1a2   : > { %v1515_v17 = vadd.f32 %v1514_v11, %v1513_v15  ;;  %v1464_v5 = vadd.f32 %v1463_v62, %v1462_v8 }
 0x1a4   : > { %v1517_v32 = vadd.f32 %v1516_v37, %v1515_v17  ;;  %v1466_v36 = vadd.f32 %v1465_v28, %v1464_v5 }
 0x1a6   : > { %v1519_v27 = vadd.f32 %v1518_v24, %v1517_v32 }
 0x1b8   : > { %v1846_v51 = vpop.f32.mrf.mxu1 }
 0x1b9   : > { %v1782_v52 = vpack.c.bf16 %v1846_v51, %v1846_v51  ;;  %v1499_v35 = vmul.f32 %v1846_v51, %v1846_v51  ;;  %v1471_v20 = vsel %vm1081_vm2, %v1846_v51, 0.0 }
 0x1ba   : > { %v1340_v54 = vpop.f32.mrf.mxu1 }
 0x1bb   : > { %1446 = vst.msk [vmem:[%s2739_s10 + $0x28] sm:$0xf] %vm1435_vm6, %v1782_v52  ;;  %v1780_v29 = vpack.c.bf16 %v1340_v54, %v1340_v54  ;;  %v1497_v18 = vmul.f32 %v1340_v54, %v1340_v54  ;;  %v1467_v19 = vsel %vm1081_vm2, %v1340_v54, 0.0  ;;  %v1524_v40 = vsel %vm1081_vm2, %v1499_v35, 0.0 }
 0x1bc   : > { %v1847_v55 = vpop.f32.mrf.mxu1  ;;  %v1468_v26 = vadd.f32 %v1467_v19, %v1466_v36 }
 0x1bd   : > { %1444 = vst.msk [vmem:[%s2739_s10 + $0x20] sm:$0xf] %vm1435_vm6, %v1780_v29  ;;  %v1783_v56 = vpack.c.bf16 %v1847_v55, %v1847_v55  ;;  %v1520_v23 = vsel %vm1081_vm2, %v1497_v18, 0.0  ;;  %v1500_v7 = vmul.f32 %v1847_v55, %v1847_v55  ;;  %v1473_v42 = vsel %vm1081_vm2, %v1847_v55, 0.0 }
 0x1be   : > { %v1343_v59 = vpop.f32.mrf.mxu1  ;;  %v1521_v30 = vadd.f32 %v1520_v23, %v1519_v27 }
 0x1bf   : > { %1447 = vst.msk [vmem:[%s2739_s10 + $0x2c] sm:$0xf] %vm1435_vm6, %v1783_v56  ;;  %v1781_v60 = vpack.c.bf16 %v1343_v59, %v1343_v59  ;;  %v1498_v12 = vmul.f32 %v1343_v59, %v1343_v59  ;;  %v1469_v13 = vsel %vm1081_vm2, %v1343_v59, 0.0  ;;  %v1526_v0 = vsel %vm1081_vm2, %v1500_v7, 0.0 }
 0x1c0   : > { %v1470_v31 = vadd.f32 %v1469_v13, %v1468_v26 }
 0x1c1   : > { %1445 = vst.msk [vmem:[%s2739_s10 + $0x24] sm:$0xf] %vm1435_vm6, %v1781_v60  ;;  %v1522_v58 = vsel %vm1081_vm2, %v1498_v12, 0.0 }
 0x1c2   : > { %v1523_v33 = vadd.f32 %v1522_v58, %v1521_v30  ;;  %v1472_v1 = vadd.f32 %v1471_v20, %v1470_v31 }
 0x1c4   : > { %v1525_v43 = vadd.f32 %v1524_v40, %v1523_v33  ;;  %v1474_v9 = vadd.f32 %v1473_v42, %v1472_v1 }
 0x1c6   : > { %v1527_v46 = vadd.f32 %v1526_v0, %v1525_v43 }
 0x1d5   : > { %v1850_v38 = vpop.f32.mrf.mxu1 }
 0x1d6   : > { %v1786_v10 = vpack.c.bf16 %v1850_v38, %v1850_v38  ;;  %v1503_v14 = vmul.f32 %v1850_v38, %v1850_v38  ;;  %v1479_v52 = vsel %vm1081_vm2, %v1850_v38, 0.0 }
 0x1d7   : > { %v1356_v41 = vpop.f32.mrf.mxu1 }
 0x1d8   : > { %1450 = vst.msk [vmem:[%s2739_s10 + $0x38] sm:$0xf] %vm1435_vm6, %v1786_v10  ;;  %v1784_v22 = vpack.c.bf16 %v1356_v41, %v1356_v41  ;;  %v1475_v3 = vsel %vm1081_vm2, %v1356_v41, 0.0  ;;  %v1501_v63 = vmul.f32 %v1356_v41, %v1356_v41  ;;  %v1532_v57 = vsel %vm1081_vm2, %v1503_v14, 0.0 }
 0x1d9   : > { %v1851_v6 = vpop.f32.mrf.mxu1  ;;  %v1476_v45 = vadd.f32 %v1475_v3, %v1474_v9 }
 0x1da   : > { %1448 = vst.msk [vmem:[%s2739_s10 + $0x30] sm:$0xf] %vm1435_vm6, %v1784_v22  ;;  %v1528_v44 = vsel %vm1081_vm2, %v1501_v63, 0.0  ;;  %v1787_v39 = vpack.c.bf16 %v1851_v6, %v1851_v6  ;;  %v1504_v54 = vmul.f32 %v1851_v6, %v1851_v6  ;;  %v1481_v59 = vsel %vm1081_vm2, %v1851_v6, 0.0 }
 0x1db   : > { %v1359_v21 = vpop.f32.mrf.mxu1  ;;  %v1529_v47 = vadd.f32 %v1528_v44, %v1527_v46 }
 0x1dc   : > { %1451 = vst.msk [vmem:[%s2739_s10 + $0x3c] sm:$0xf] %vm1435_vm6, %v1787_v39  ;;  %v1785_v48 = vpack.c.bf16 %v1359_v21, %v1359_v21  ;;  %v1477_v49 = vsel %vm1081_vm2, %v1359_v21, 0.0  ;;  %v1502_v50 = vmul.f32 %v1359_v21, %v1359_v21  ;;  %v1534_v2 = vsel %vm1081_vm2, %v1504_v54, 0.0 }
 0x1dd   : > { %v1478_v51 = vadd.f32 %v1477_v49, %v1476_v45 }
 0x1de   : > { %1449 = vst.msk [vmem:[%s2739_s10 + $0x34] sm:$0xf] %vm1435_vm6, %v1785_v48  ;;  %v1530_v29 = vsel %vm1081_vm2, %v1502_v50, 0.0 }
 0x1df   : > { %v1480_v55 = vadd.f32 %v1479_v52, %v1478_v51  ;;  %v1531_v56 = vadd.f32 %v1530_v29, %v1529_v47 }
 0x1e1   : > { %v1482_v60 = vadd.f32 %v1481_v59, %v1480_v55  ;;  %v1533_v61 = vadd.f32 %v1532_v57, %v1531_v56 }
 0x1e3   : > { %v1483_v4 = vrot.slane %v1482_v60, 4  ;;  %v1535_v53 = vadd.f32 %v1534_v2, %v1533_v61 }
 0x1e5   : > { %v1484_v25 = vadd.f32 %v1483_v4, %v1482_v60  ;;  %v1536_v11 = vrot.slane %v1535_v53, 4 }
 0x1e7   : > { %v1485_v15 = vrot.slane %v1484_v25, 2  ;;  %v1537_v8 = vadd.f32 %v1536_v11, %v1535_v53 }
 0x1e9   : > { %v1486_v16 = vadd.f32 %v1485_v15, %v1484_v25  ;;  %v1538_v17 = vrot.slane %v1537_v8, 2 }
 0x1eb   : > { %v1487_v62 = vrot.slane %v1486_v16, 1  ;;  %v1539_v5 = vadd.f32 %v1538_v17, %v1537_v8 }
 0x1ed   : > { %v1540_v37 = vrot.slane %v1539_v5, 1  ;;  %v1488_v34 = vadd.f32 %v1487_v62, %v1486_v16 }
 0x1ef   : > { %v1541_v18 = vadd.f32 %v1540_v37, %v1539_v5 }
 0x1f1   : > { %v1543_v32 = vsel %vm1542_vm11, %v1488_v34, %v1541_v18 }
 0x1f2   : > { %1545 = vst.msk [vmem:[%s394_s14] sm:$0x3] %vm1544_vm0, %v1543_v32 }
 0x1f3 PF: > { %s17_s25 = sadd.s32 1, %s1958_s25   ;;  %s2873_s21 = smov %s1950_s23 }
 0x1f4   : > { %p14_p10 = scmp.ge.s32.totalorder %s17_s25, 6   ;;  %s2874_s22 = smov %s1954_s24 }
 0x1f5   : > { %s2875_s23 = smov %s2878_s26  ;;  %s2876_s24 = smov %s2882_s27 }
 0x1f6   :  { %16 = sbr.rel (!%p14_p10) target bundleno = 3 (0x3), region = 85 }

</bundles_post_ra>
